<compile_context>
chip_gen: v7x
topology: tpu7x:2x2x1
jax: 0.10.0
libtpu: 0.0.40
codegen_flags: <defaults>
</compile_context>

<pallas_src>
import functools

import jax
import jax.numpy as jnp
import numpy as np
from jax import lax
from jax.experimental import pallas as pl
from jax.experimental.pallas import tpu as pltpu


# ----------------------------- config ---------------------------------------
FEAT_DIM = 32      # config.feat_dim
IN_DIM = 32        # config.in_dim (must equal feat_dim, as in the torch code)
HIDDEN = 32        # config.hidden
N_HEADS = 2        # config.n_heads
NUM_CLASSES = 8    # config.num_classes
N_NODES = 256      # number of rows in data.x


# ----------------------------- kernel ---------------------------------------
def tree_track_kernel(x_ref, mid_ref, wf_ref, bf_ref, track_ref, attn_ref,
                      *, n_heads, hidden, num_classes):
    x = x_ref[...]                                     # (TN, feat) node-major
    is_mid = mid_ref[...] > 0.5                        # (1, TN)
    hh = n_heads * hidden

    # Single fused MXU pass: rows [0, hh) of the fused weight are Wv^T, rows
    # [hh, hh + H*C) are blockdiag(k_h) @ Wq^T (folded offline).  Both
    # operands contract on their last axis (A @ B^T form) so x needs no
    # transpose anywhere.
    proj = lax.dot_general(
        wf_ref[...], x,
        dimension_numbers=(((1,), (1,)), ((), ())),
        preferred_element_type=jnp.float32) + bf_ref[...]         # (hh+H*C, TN)

    vT = proj[:hh, :]                                  # (hh, TN)
    scoresT = proj[hh:, :]                             # (H*C, TN)

    inv_c = jnp.float32(1.0 / num_classes)
    attn_acc = jnp.zeros((num_classes, x.shape[0]), jnp.float32)

    for h in range(n_heads):                           # tiny, unrolled
        s = scoresT[h * num_classes:(h + 1) * num_classes, :]     # (C, TN)
        m = jnp.max(s, axis=0, keepdims=True)
        e = jnp.exp(s - m)
        denom = jnp.sum(e, axis=0, keepdims=True)
        # exact reciprocal: approx=True would not meet the 1e-4/1e-5 check
        alpha = e * pl.reciprocal(denom, approx=False)             # (C, TN)
        alpha = jnp.where(is_mid, inv_c, alpha)

        attn_acc = attn_acc + alpha

        # sharpness: exp(-entropy) = exp(sum(alpha * log(alpha + 1e-6)))
        sharp = jnp.exp(jnp.sum(alpha * jnp.log(alpha + 1e-6),
                                axis=0, keepdims=True))            # (1, TN)

        # Fold sharp into alpha (C x TN mults) rather than into v (hid x TN).
        alpha_s = alpha * sharp                                    # (C, TN)
        vh = vT[h * hidden:(h + 1) * hidden, :]                    # (hid, TN)

        # Stream the (C, hid, TN) outer product one class at a time: at most
        # one (hid, TN) slab is live, so nothing spills around the full-width
        # lane-dense track stores (v5e single vst port is the binding slot).
        for ci in range(num_classes):
            track_ref[ci, h * hidden:(h + 1) * hidden, :] = (
                alpha_s[ci:ci + 1, :] * vh)

    attn_ref[...] = attn_acc * jnp.float32(1.0 / n_heads)


# ----------------------- one-time parameter prep -----------------------------
def prepare_tree_track_params(prototype, params, *, n_heads=N_HEADS,
                              hidden=HIDDEN):
    """Hoisted out of the call path (do once per parameter set).

    Folds key_input(prototype) and the query projection into the fused weight:
        rows [0, hh)        : Wv^T                   -> v^T   = Wv^T x^T + bv
        rows [hh, hh + H*C) : blockdiag(k_h) @ Wq^T  -> s_h^T = (k_h Wq_h^T) x^T + k_h bq_h
    """
    prototype = prototype.astype(jnp.float32)
    wq = params["wq"].astype(jnp.float32)
    bq = params["bq"].astype(jnp.float32)
    wv = params["wv"].astype(jnp.float32)
    bv = params["bv"].astype(jnp.float32)
    wk = params["wk"].astype(jnp.float32)
    bk = params["bk"].astype(jnp.float32)

    k = prototype @ wk + bk                                        # (C, hh)
    w_rows, b_rows = [wv.T], [bv]
    for h in range(n_heads):
        kh = k[:, h * hidden:(h + 1) * hidden]                     # (C, hid)
        wqh = wq[:, h * hidden:(h + 1) * hidden]                   # (feat, hid)
        bqh = bq[h * hidden:(h + 1) * hidden]                      # (hid,)
        w_rows.append(kh @ wqh.T)                                  # (C, feat)
        b_rows.append(kh @ bqh)                                    # (C,)
    w_fused = jnp.concatenate(w_rows, axis=0)                      # (hh+H*C, feat)
    b_fused = jnp.concatenate(b_rows).reshape(-1, 1)               # (hh+H*C, 1)
    return w_fused, b_fused


def _is_two_tensorcore_chip():
    """v7x-style chips have 2 TensorCores per chip; v5e/v6e have 1."""
    try:
        kind = jax.devices()[0].device_kind.lower()
    except Exception:
        return False
    return ("v7" in kind) or ("7x" in kind) or ("tpu7" in kind)


# ----------------------------- wrapper ---------------------------------------
@functools.partial(jax.jit, static_argnames=("n_heads", "hidden", "node_major"))
def tree_track_builder(x, mid_mask, w_fused, b_fused, *, n_heads=N_HEADS,
                       hidden=HIDDEN, node_major=False):
    """Forward pass for data.x / data.mid_mask with pre-folded parameters.

    Default returns the module layout (track (C, N, H*hidden), attn (N, C)).
    node_major=True returns the kernel-native lane-dense layout
    ((C, H*hidden, N), (C, N)) so a downstream matmul/einsum can absorb the
    layout instead of paying an extra HBM pass for the transpose."""
    n, feat_dim = x.shape
    hh = n_heads * hidden
    num_classes = (w_fused.shape[0] - hh) // n_heads

    x = x.astype(jnp.float32)
    mid_row = mid_mask.astype(jnp.float32).reshape(1, n)

    # --- tile selection (trace-time; shapes are static) -----------------------
    two_core = _is_two_tensorcore_chip()
    n128 = ((n + 127) // 128) * 128                    # node (lane) axis dense
    if two_core:
        # 2 TensorCores: at least 2 grid steps so both cores get work, but
        # keep per-core tiles big (per-step overhead ~0.35us; VMEM is nowhere
        # near a constraint: a 1024-wide track block is only 2 MiB).
        half = (((n128 // 2) + 127) // 128) * 128
        tile_n = max(128, min(1024, half))
    else:
        # single TensorCore (v5e/v6e): one big tile when it fits.
        tile_n = min(512, n128)
    n_pad = ((n128 + tile_n - 1) // tile_n) * tile_n
    if n_pad != n:
        x = jnp.pad(x, ((0, n_pad - n), (0, 0)))
        mid_row = jnp.pad(mid_row, ((0, 0), (0, n_pad - n)))
    grid = (n_pad // tile_n,)

    kern = functools.partial(tree_track_kernel, n_heads=n_heads, hidden=hidden,
                             num_classes=num_classes)

    # "parallel" shards the grid axis across TensorCores on multi-core chips
    # and is always valid on single-core chips -> one call, no fallback
    # re-trace and no risk of silently running on one core.
    trackT, attnT = pl.pallas_call(
        kern,
        out_shape=(
            jax.ShapeDtypeStruct((num_classes, hh, n_pad), jnp.float32),  # track^T
            jax.ShapeDtypeStruct((num_classes, n_pad), jnp.float32),      # attn^T
        ),
        grid_spec=pltpu.PrefetchScalarGridSpec(
            num_scalar_prefetch=0,
            grid=grid,
            in_specs=[
                pl.BlockSpec((tile_n, feat_dim), lambda i: (i, 0)),       # x (node-major)
                pl.BlockSpec((1, tile_n), lambda i: (0, i)),              # mid mask row
                pl.BlockSpec((hh + n_heads * num_classes, feat_dim),
                             lambda i: (0, 0)),                           # fused W
                pl.BlockSpec((hh + n_heads * num_classes, 1),
                             lambda i: (0, 0)),                           # fused b
            ],
            out_specs=[
                pl.BlockSpec((num_classes, hh, tile_n), lambda i: (0, 0, i)),
                pl.BlockSpec((num_classes, tile_n), lambda i: (0, i)),
            ],
        ),
        compiler_params=pltpu.CompilerParams(dimension_semantics=("parallel",)),
    )(x, mid_row, w_fused, b_fused)

    if node_major:
        return trackT[:, :, :n], attnT[:, :n]

    # Module-layout outputs: (C, hh, N)->(C, N, hh) and (C, N)->(N, C).
    # TODO(synk): downstream consumers should prefer node_major=True and fold
    # this layout into their own dimension_numbers to skip the extra HBM pass.
    track = jnp.transpose(trackT[:, :, :n], (0, 2, 1))
    attn = attnT[:, :n].T
    return track, attn


# ----------------------------- reference (pure JAX) ---------------------------
def reference(prototype, x, mid_mask, params):
    n = x.shape[0]
    c = prototype.shape[0]
    v = x @ params["wv"] + params["bv"]
    q = x @ params["wq"] + params["bq"]
    k = prototype @ params["wk"] + params["bk"]
    vh = jnp.transpose(v.reshape(n, N_HEADS, HIDDEN), (1, 0, 2))   # (H, N, hid)
    qh = jnp.transpose(q.reshape(n, N_HEADS, HIDDEN), (1, 0, 2))
    kh = jnp.transpose(k.reshape(c, N_HEADS, HIDDEN), (1, 0, 2))   # (H, C, hid)
    scores = jnp.einsum("hnd,hcd->hnc", qh, kh)
    alpha = jax.nn.softmax(scores, axis=-1)
    alpha = jnp.where(mid_mask[None, :, None], 1.0 / c, alpha)
    attn = jnp.mean(alpha, axis=0)
    sharp = jnp.exp(jnp.sum(alpha * jnp.log(alpha + 1e-6), axis=-1))  # (H, N)
    track = vh[:, :, None, :] * alpha[:, :, :, None] * sharp[:, :, None, None]
    track = jnp.concatenate([track[i] for i in range(N_HEADS)], axis=-1)  # (N,C,hh)
    return jnp.transpose(track, (1, 0, 2)), attn


# ----------------------------- main -------------------------------------------
if __name__ == "__main__":
    key = jax.random.PRNGKey(0)
    ks = jax.random.split(key, 10)

    def linear_init(kw, kb, fan_in, fan_out):
        bound = 1.0 / np.sqrt(fan_in)
        w = jax.random.uniform(kw, (fan_in, fan_out), jnp.float32, -bound, bound)
        b = jax.random.uniform(kb, (fan_out,), jnp.float32, -bound, bound)
        return w, b

    hh = N_HEADS * HIDDEN
    wv, bv = linear_init(ks[0], ks[1], FEAT_DIM, hh)   # value_input (dropout = identity in eval)
    wq, bq = linear_init(ks[2], ks[3], IN_DIM, hh)     # query_input
    wk, bk = linear_init(ks[4], ks[5], IN_DIM, hh)     # key_input
    # TODO(synk): raw_query_input / out_layer are never reached by forward(); not instantiated.
    params = dict(wv=wv, bv=bv, wq=wq, bq=bq, wk=wk, bk=bk)

    prototype = jax.random.normal(ks[6], (NUM_CLASSES, IN_DIM), jnp.float32)
    pre_emb = jax.random.normal(ks[7], (N_NODES, IN_DIM), jnp.float32)  # unused by forward
    x = jax.random.normal(ks[8], (N_NODES, FEAT_DIM), jnp.float32)
    mid_mask = jax.random.bernoulli(ks[9], 0.3, (N_NODES,))

    # One-time, per-parameter-set preparation — hoisted out of the call path.
    w_fused, b_fused = prepare_tree_track_params(prototype, params)
    w_fused, b_fused = jax.block_until_ready((w_fused, b_fused))

    track_h, attn = tree_track_builder(x, mid_mask, w_fused, b_fused)
    jax.block_until_ready((track_h, attn))

    track_ref, attn_ref = reference(prototype, x, mid_mask, params)
    np.testing.assert_allclose(np.asarray(attn), np.asarray(attn_ref),
                               rtol=1e-4, atol=1e-5)
    np.testing.assert_allclose(np.asarray(track_h), np.asarray(track_ref),
                               rtol=1e-4, atol=1e-5)

    assert track_h.shape == (NUM_CLASSES, N_NODES, N_HEADS * HIDDEN)
    assert attn.shape == (N_NODES, NUM_CLASSES)
    print("KERNEL_OK")
</pallas_src>

<mosaic_0001>
module attributes {stable_mosaic.version = 11 : i64} {
  func.func @tree_track_kernel(%arg0: i32, %arg1: memref<256x32xf32, #tpu.memory_space<vmem>>, %arg2: memref<1x256xf32, #tpu.memory_space<vmem>>, %arg3: memref<80x32xf32, #tpu.memory_space<vmem>>, %arg4: memref<80x1xf32, #tpu.memory_space<vmem>>, %arg5: memref<8x64x256xf32, #tpu.memory_space<vmem>>, %arg6: memref<8x256xf32, #tpu.memory_space<vmem>>) attributes {dimension_semantics = [#tpu.dimension_semantics<parallel>], iteration_bounds = array<i64: 1>, scalar_prefetch = 0 : i64, scratch_operands = 0 : i64, tpu.core_type = #tpu.core_type<tc>, window_params = [{transform_indices = @transform_0, window_bounds = array<i64: 256, 32>}, {transform_indices = @transform_1, window_bounds = array<i64: 1, 256>}, {pipeline_mode = #tpu.pipeline_mode<synchronous>, transform_indices = @transform_2, window_bounds = array<i64: 80, 32>}, {pipeline_mode = #tpu.pipeline_mode<synchronous>, transform_indices = @transform_3, window_bounds = array<i64: 80, 1>}, {transform_indices = @transform_4, window_bounds = array<i64: 8, 64, 256>}, {transform_indices = @transform_5, window_bounds = array<i64: 8, 256>}]} {
    %c0 = arith.constant 0 : index
    %c0_0 = arith.constant 0 : index
    %0 = vector.load %arg1[%c0, %c0_0] : memref<256x32xf32, #tpu.memory_space<vmem>>, vector<256x32xf32>
    %c0_1 = arith.constant 0 : index
    %c0_2 = arith.constant 0 : index
    %1 = vector.load %arg2[%c0_1, %c0_2] : memref<1x256xf32, #tpu.memory_space<vmem>>, vector<1x256xf32>
    %cst = arith.constant 5.000000e-01 : f32
    %2 = vector.broadcast %cst : f32 to vector<1x256xf32>
    %3 = arith.cmpf ogt, %1, %2 : vector<1x256xf32>
    %c0_3 = arith.constant 0 : index
    %c0_4 = arith.constant 0 : index
    %4 = vector.load %arg3[%c0_3, %c0_4] : memref<80x32xf32, #tpu.memory_space<vmem>>, vector<80x32xf32>
    %cst_5 = arith.constant dense<0.000000e+00> : vector<80x256xf32>
    %5 = tpu.matmul %4, %0, %cst_5 {dimension_numbers = #tpu.dot_dimension_numbers<[1], [1], [0], [0], [0, 0, 1, 0], [], []>} : vector<80x32xf32>, vector<256x32xf32>, vector<80x256xf32> -> vector<80x256xf32>
    %c0_6 = arith.constant 0 : index
    %c0_7 = arith.constant 0 : index
    %6 = vector.load %arg4[%c0_6, %c0_7] : memref<80x1xf32, #tpu.memory_space<vmem>>, vector<80x1xf32>
    %7 = vector.broadcast %6 : vector<80x1xf32> to vector<80x256xf32>
    %8 = arith.addf %5, %7 : vector<80x256xf32>
    %9 = vector.extract_strided_slice %8 {offsets = [0, 0], sizes = [64, 256], strides = [1, 1]} : vector<80x256xf32> to vector<64x256xf32>
    %10 = vector.extract_strided_slice %8 {offsets = [64, 0], sizes = [16, 256], strides = [1, 1]} : vector<80x256xf32> to vector<16x256xf32>
    %cst_8 = arith.constant 0.000000e+00 : f32
    %11 = vector.broadcast %cst_8 : f32 to vector<8x256xf32>
    %12 = vector.extract_strided_slice %10 {offsets = [0, 0], sizes = [8, 256], strides = [1, 1]} : vector<16x256xf32> to vector<8x256xf32>
    %cst_9 = arith.constant dense<0xFF800000> : vector<256xf32>
    %13 = vector.multi_reduction <maximumf>, %12, %cst_9 [0] : vector<8x256xf32> to vector<256xf32>
    %14 = vector.shape_cast %13 : vector<256xf32> to vector<1x256xf32>
    %15 = vector.broadcast %14 : vector<1x256xf32> to vector<8x256xf32>
    %16 = arith.subf %12, %15 : vector<8x256xf32>
    %17 = math.exp %16 : vector<8x256xf32>
    %cst_10 = arith.constant dense<0.000000e+00> : vector<256xf32>
    %18 = vector.multi_reduction <add>, %17, %cst_10 [0] : vector<8x256xf32> to vector<256xf32>
    %19 = vector.shape_cast %18 : vector<256xf32> to vector<1x256xf32>
    %20 = tpu.reciprocal %19 : vector<1x256xf32> -> vector<1x256xf32>
    %21 = vector.broadcast %20 : vector<1x256xf32> to vector<8x256xf32>
    %22 = arith.mulf %17, %21 : vector<8x256xf32>
    %cst_11 = arith.constant 1.250000e-01 : f32
    %23 = vector.shape_cast %3 : vector<1x256xi1> to vector<1x256xi1>
    %24 = vector.broadcast %23 : vector<1x256xi1> to vector<8x256xi1>
    %25 = vector.broadcast %cst_11 : f32 to vector<8x256xf32>
    %26 = arith.select %24, %25, %22 : vector<8x256xi1>, vector<8x256xf32>
    %27 = arith.addf %11, %26 : vector<8x256xf32>
    %cst_12 = arith.constant 9.99999997E-7 : f32
    %28 = vector.broadcast %cst_12 : f32 to vector<8x256xf32>
    %29 = arith.addf %26, %28 : vector<8x256xf32>
    %30 = math.log %29 : vector<8x256xf32>
    %31 = arith.mulf %26, %30 : vector<8x256xf32>
    %cst_13 = arith.constant dense<0.000000e+00> : vector<256xf32>
    %32 = vector.multi_reduction <add>, %31, %cst_13 [0] : vector<8x256xf32> to vector<256xf32>
    %33 = vector.shape_cast %32 : vector<256xf32> to vector<1x256xf32>
    %34 = math.exp %33 : vector<1x256xf32>
    %35 = vector.broadcast %34 : vector<1x256xf32> to vector<8x256xf32>
    %36 = arith.mulf %26, %35 : vector<8x256xf32>
    %37 = vector.extract_strided_slice %9 {offsets = [0, 0], sizes = [32, 256], strides = [1, 1]} : vector<64x256xf32> to vector<32x256xf32>
    %38 = vector.extract_strided_slice %36 {offsets = [0, 0], sizes = [1, 256], strides = [1, 1]} : vector<8x256xf32> to vector<1x256xf32>
    %39 = vector.broadcast %38 : vector<1x256xf32> to vector<32x256xf32>
    %40 = arith.mulf %39, %37 : vector<32x256xf32>
    %c0_14 = arith.constant 0 : index
    %c0_15 = arith.constant 0 : index
    %c0_16 = arith.constant 0 : index
    %41 = vector.load %arg5[%c0_14, %c0_15, %c0_16] : memref<8x64x256xf32, #tpu.memory_space<vmem>>, vector<1x32x256xf32>
    %42 = vector.shape_cast %41 : vector<1x32x256xf32> to vector<32x256xf32>
    %43 = vector.shape_cast %40 : vector<32x256xf32> to vector<1x32x256xf32>
    tpu.vector_store %arg5[%c0_14, %c0_15, %c0_16], %43 {strides = array<i32>} : memref<8x64x256xf32, #tpu.memory_space<vmem>>, vector<1x32x256xf32>,
    %44 = vector.extract_strided_slice %36 {offsets = [1, 0], sizes = [1, 256], strides = [1, 1]} : vector<8x256xf32> to vector<1x256xf32>
    %45 = vector.broadcast %44 : vector<1x256xf32> to vector<32x256xf32>
    %46 = arith.mulf %45, %37 : vector<32x256xf32>
    %c1 = arith.constant 1 : index
    %c0_17 = arith.constant 0 : index
    %c0_18 = arith.constant 0 : index
    %47 = vector.load %arg5[%c1, %c0_17, %c0_18] : memref<8x64x256xf32, #tpu.memory_space<vmem>>, vector<1x32x256xf32>
    %48 = vector.shape_cast %47 : vector<1x32x256xf32> to vector<32x256xf32>
    %49 = vector.shape_cast %46 : vector<32x256xf32> to vector<1x32x256xf32>
    tpu.vector_store %arg5[%c1, %c0_17, %c0_18], %49 {strides = array<i32>} : memref<8x64x256xf32, #tpu.memory_space<vmem>>, vector<1x32x256xf32>,
    %50 = vector.extract_strided_slice %36 {offsets = [2, 0], sizes = [1, 256], strides = [1, 1]} : vector<8x256xf32> to vector<1x256xf32>
    %51 = vector.broadcast %50 : vector<1x256xf32> to vector<32x256xf32>
    %52 = arith.mulf %51, %37 : vector<32x256xf32>
    %c2 = arith.constant 2 : index
    %c0_19 = arith.constant 0 : index
    %c0_20 = arith.constant 0 : index
    %53 = vector.load %arg5[%c2, %c0_19, %c0_20] : memref<8x64x256xf32, #tpu.memory_space<vmem>>, vector<1x32x256xf32>
    %54 = vector.shape_cast %53 : vector<1x32x256xf32> to vector<32x256xf32>
    %55 = vector.shape_cast %52 : vector<32x256xf32> to vector<1x32x256xf32>
    tpu.vector_store %arg5[%c2, %c0_19, %c0_20], %55 {strides = array<i32>} : memref<8x64x256xf32, #tpu.memory_space<vmem>>, vector<1x32x256xf32>,
    %56 = vector.extract_strided_slice %36 {offsets = [3, 0], sizes = [1, 256], strides = [1, 1]} : vector<8x256xf32> to vector<1x256xf32>
    %57 = vector.broadcast %56 : vector<1x256xf32> to vector<32x256xf32>
    %58 = arith.mulf %57, %37 : vector<32x256xf32>
    %c3 = arith.constant 3 : index
    %c0_21 = arith.constant 0 : index
    %c0_22 = arith.constant 0 : index
    %59 = vector.load %arg5[%c3, %c0_21, %c0_22] : memref<8x64x256xf32, #tpu.memory_space<vmem>>, vector<1x32x256xf32>
    %60 = vector.shape_cast %59 : vector<1x32x256xf32> to vector<32x256xf32>
    %61 = vector.shape_cast %58 : vector<32x256xf32> to vector<1x32x256xf32>
    tpu.vector_store %arg5[%c3, %c0_21, %c0_22], %61 {strides = array<i32>} : memref<8x64x256xf32, #tpu.memory_space<vmem>>, vector<1x32x256xf32>,
    %62 = vector.extract_strided_slice %36 {offsets = [4, 0], sizes = [1, 256], strides = [1, 1]} : vector<8x256xf32> to vector<1x256xf32>
    %63 = vector.broadcast %62 : vector<1x256xf32> to vector<32x256xf32>
    %64 = arith.mulf %63, %37 : vector<32x256xf32>
    %c4 = arith.constant 4 : index
    %c0_23 = arith.constant 0 : index
    %c0_24 = arith.constant 0 : index
    %65 = vector.load %arg5[%c4, %c0_23, %c0_24] : memref<8x64x256xf32, #tpu.memory_space<vmem>>, vector<1x32x256xf32>
    %66 = vector.shape_cast %65 : vector<1x32x256xf32> to vector<32x256xf32>
    %67 = vector.shape_cast %64 : vector<32x256xf32> to vector<1x32x256xf32>
    tpu.vector_store %arg5[%c4, %c0_23, %c0_24], %67 {strides = array<i32>} : memref<8x64x256xf32, #tpu.memory_space<vmem>>, vector<1x32x256xf32>,
    %68 = vector.extract_strided_slice %36 {offsets = [5, 0], sizes = [1, 256], strides = [1, 1]} : vector<8x256xf32> to vector<1x256xf32>
    %69 = vector.broadcast %68 : vector<1x256xf32> to vector<32x256xf32>
    %70 = arith.mulf %69, %37 : vector<32x256xf32>
    %c5 = arith.constant 5 : index
    %c0_25 = arith.constant 0 : index
    %c0_26 = arith.constant 0 : index
    %71 = vector.load %arg5[%c5, %c0_25, %c0_26] : memref<8x64x256xf32, #tpu.memory_space<vmem>>, vector<1x32x256xf32>
    %72 = vector.shape_cast %71 : vector<1x32x256xf32> to vector<32x256xf32>
    %73 = vector.shape_cast %70 : vector<32x256xf32> to vector<1x32x256xf32>
    tpu.vector_store %arg5[%c5, %c0_25, %c0_26], %73 {strides = array<i32>} : memref<8x64x256xf32, #tpu.memory_space<vmem>>, vector<1x32x256xf32>,
    %74 = vector.extract_strided_slice %36 {offsets = [6, 0], sizes = [1, 256], strides = [1, 1]} : vector<8x256xf32> to vector<1x256xf32>
    %75 = vector.broadcast %74 : vector<1x256xf32> to vector<32x256xf32>
    %76 = arith.mulf %75, %37 : vector<32x256xf32>
    %c6 = arith.constant 6 : index
    %c0_27 = arith.constant 0 : index
    %c0_28 = arith.constant 0 : index
    %77 = vector.load %arg5[%c6, %c0_27, %c0_28] : memref<8x64x256xf32, #tpu.memory_space<vmem>>, vector<1x32x256xf32>
    %78 = vector.shape_cast %77 : vector<1x32x256xf32> to vector<32x256xf32>
    %79 = vector.shape_cast %76 : vector<32x256xf32> to vector<1x32x256xf32>
    tpu.vector_store %arg5[%c6, %c0_27, %c0_28], %79 {strides = array<i32>} : memref<8x64x256xf32, #tpu.memory_space<vmem>>, vector<1x32x256xf32>,
    %80 = vector.extract_strided_slice %36 {offsets = [7, 0], sizes = [1, 256], strides = [1, 1]} : vector<8x256xf32> to vector<1x256xf32>
    %81 = vector.broadcast %80 : vector<1x256xf32> to vector<32x256xf32>
    %82 = arith.mulf %81, %37 : vector<32x256xf32>
    %c7 = arith.constant 7 : index
    %c0_29 = arith.constant 0 : index
    %c0_30 = arith.constant 0 : index
    %83 = vector.load %arg5[%c7, %c0_29, %c0_30] : memref<8x64x256xf32, #tpu.memory_space<vmem>>, vector<1x32x256xf32>
    %84 = vector.shape_cast %83 : vector<1x32x256xf32> to vector<32x256xf32>
    %85 = vector.shape_cast %82 : vector<32x256xf32> to vector<1x32x256xf32>
    tpu.vector_store %arg5[%c7, %c0_29, %c0_30], %85 {strides = array<i32>} : memref<8x64x256xf32, #tpu.memory_space<vmem>>, vector<1x32x256xf32>,
    %86 = vector.extract_strided_slice %10 {offsets = [8, 0], sizes = [8, 256], strides = [1, 1]} : vector<16x256xf32> to vector<8x256xf32>
    %cst_31 = arith.constant dense<0xFF800000> : vector<256xf32>
    %87 = vector.multi_reduction <maximumf>, %86, %cst_31 [0] : vector<8x256xf32> to vector<256xf32>
    %88 = vector.shape_cast %87 : vector<256xf32> to vector<1x256xf32>
    %89 = vector.broadcast %88 : vector<1x256xf32> to vector<8x256xf32>
    %90 = arith.subf %86, %89 : vector<8x256xf32>
    %91 = math.exp %90 : vector<8x256xf32>
    %cst_32 = arith.constant dense<0.000000e+00> : vector<256xf32>
    %92 = vector.multi_reduction <add>, %91, %cst_32 [0] : vector<8x256xf32> to vector<256xf32>
    %93 = vector.shape_cast %92 : vector<256xf32> to vector<1x256xf32>
    %94 = tpu.reciprocal %93 : vector<1x256xf32> -> vector<1x256xf32>
    %95 = vector.broadcast %94 : vector<1x256xf32> to vector<8x256xf32>
    %96 = arith.mulf %91, %95 : vector<8x256xf32>
    %cst_33 = arith.constant 1.250000e-01 : f32
    %97 = vector.shape_cast %3 : vector<1x256xi1> to vector<1x256xi1>
    %98 = vector.broadcast %97 : vector<1x256xi1> to vector<8x256xi1>
    %99 = vector.broadcast %cst_33 : f32 to vector<8x256xf32>
    %100 = arith.select %98, %99, %96 : vector<8x256xi1>, vector<8x256xf32>
    %101 = arith.addf %27, %100 : vector<8x256xf32>
    %cst_34 = arith.constant 9.99999997E-7 : f32
    %102 = vector.broadcast %cst_34 : f32 to vector<8x256xf32>
    %103 = arith.addf %100, %102 : vector<8x256xf32>
    %104 = math.log %103 : vector<8x256xf32>
    %105 = arith.mulf %100, %104 : vector<8x256xf32>
    %cst_35 = arith.constant dense<0.000000e+00> : vector<256xf32>
    %106 = vector.multi_reduction <add>, %105, %cst_35 [0] : vector<8x256xf32> to vector<256xf32>
    %107 = vector.shape_cast %106 : vector<256xf32> to vector<1x256xf32>
    %108 = math.exp %107 : vector<1x256xf32>
    %109 = vector.broadcast %108 : vector<1x256xf32> to vector<8x256xf32>
    %110 = arith.mulf %100, %109 : vector<8x256xf32>
    %111 = vector.extract_strided_slice %9 {offsets = [32, 0], sizes = [32, 256], strides = [1, 1]} : vector<64x256xf32> to vector<32x256xf32>
    %112 = vector.extract_strided_slice %110 {offsets = [0, 0], sizes = [1, 256], strides = [1, 1]} : vector<8x256xf32> to vector<1x256xf32>
    %113 = vector.broadcast %112 : vector<1x256xf32> to vector<32x256xf32>
    %114 = arith.mulf %113, %111 : vector<32x256xf32>
    %c0_36 = arith.constant 0 : index
    %c32 = arith.constant 32 : index
    %c0_37 = arith.constant 0 : index
    %115 = vector.load %arg5[%c0_36, %c32, %c0_37] : memref<8x64x256xf32, #tpu.memory_space<vmem>>, vector<1x32x256xf32>
    %116 = vector.shape_cast %115 : vector<1x32x256xf32> to vector<32x256xf32>
    %117 = vector.shape_cast %114 : vector<32x256xf32> to vector<1x32x256xf32>
    tpu.vector_store %arg5[%c0_36, %c32, %c0_37], %117 {strides = array<i32>} : memref<8x64x256xf32, #tpu.memory_space<vmem>>, vector<1x32x256xf32>,
    %118 = vector.extract_strided_slice %110 {offsets = [1, 0], sizes = [1, 256], strides = [1, 1]} : vector<8x256xf32> to vector<1x256xf32>
    %119 = vector.broadcast %118 : vector<1x256xf32> to vector<32x256xf32>
    %120 = arith.mulf %119, %111 : vector<32x256xf32>
    %c1_38 = arith.constant 1 : index
    %c32_39 = arith.constant 32 : index
    %c0_40 = arith.constant 0 : index
    %121 = vector.load %arg5[%c1_38, %c32_39, %c0_40] : memref<8x64x256xf32, #tpu.memory_space<vmem>>, vector<1x32x256xf32>
    %122 = vector.shape_cast %121 : vector<1x32x256xf32> to vector<32x256xf32>
    %123 = vector.shape_cast %120 : vector<32x256xf32> to vector<1x32x256xf32>
    tpu.vector_store %arg5[%c1_38, %c32_39, %c0_40], %123 {strides = array<i32>} : memref<8x64x256xf32, #tpu.memory_space<vmem>>, vector<1x32x256xf32>,
    %124 = vector.extract_strided_slice %110 {offsets = [2, 0], sizes = [1, 256], strides = [1, 1]} : vector<8x256xf32> to vector<1x256xf32>
    %125 = vector.broadcast %124 : vector<1x256xf32> to vector<32x256xf32>
    %126 = arith.mulf %125, %111 : vector<32x256xf32>
    %c2_41 = arith.constant 2 : index
    %c32_42 = arith.constant 32 : index
    %c0_43 = arith.constant 0 : index
    %127 = vector.load %arg5[%c2_41, %c32_42, %c0_43] : memref<8x64x256xf32, #tpu.memory_space<vmem>>, vector<1x32x256xf32>
    %128 = vector.shape_cast %127 : vector<1x32x256xf32> to vector<32x256xf32>
    %129 = vector.shape_cast %126 : vector<32x256xf32> to vector<1x32x256xf32>
    tpu.vector_store %arg5[%c2_41, %c32_42, %c0_43], %129 {strides = array<i32>} : memref<8x64x256xf32, #tpu.memory_space<vmem>>, vector<1x32x256xf32>,
    %130 = vector.extract_strided_slice %110 {offsets = [3, 0], sizes = [1, 256], strides = [1, 1]} : vector<8x256xf32> to vector<1x256xf32>
    %131 = vector.broadcast %130 : vector<1x256xf32> to vector<32x256xf32>
    %132 = arith.mulf %131, %111 : vector<32x256xf32>
    %c3_44 = arith.constant 3 : index
    %c32_45 = arith.constant 32 : index
    %c0_46 = arith.constant 0 : index
    %133 = vector.load %arg5[%c3_44, %c32_45, %c0_46] : memref<8x64x256xf32, #tpu.memory_space<vmem>>, vector<1x32x256xf32>
    %134 = vector.shape_cast %133 : vector<1x32x256xf32> to vector<32x256xf32>
    %135 = vector.shape_cast %132 : vector<32x256xf32> to vector<1x32x256xf32>
    tpu.vector_store %arg5[%c3_44, %c32_45, %c0_46], %135 {strides = array<i32>} : memref<8x64x256xf32, #tpu.memory_space<vmem>>, vector<1x32x256xf32>,
    %136 = vector.extract_strided_slice %110 {offsets = [4, 0], sizes = [1, 256], strides = [1, 1]} : vector<8x256xf32> to vector<1x256xf32>
    %137 = vector.broadcast %136 : vector<1x256xf32> to vector<32x256xf32>
    %138 = arith.mulf %137, %111 : vector<32x256xf32>
    %c4_47 = arith.constant 4 : index
    %c32_48 = arith.constant 32 : index
    %c0_49 = arith.constant 0 : index
    %139 = vector.load %arg5[%c4_47, %c32_48, %c0_49] : memref<8x64x256xf32, #tpu.memory_space<vmem>>, vector<1x32x256xf32>
    %140 = vector.shape_cast %139 : vector<1x32x256xf32> to vector<32x256xf32>
    %141 = vector.shape_cast %138 : vector<32x256xf32> to vector<1x32x256xf32>
    tpu.vector_store %arg5[%c4_47, %c32_48, %c0_49], %141 {strides = array<i32>} : memref<8x64x256xf32, #tpu.memory_space<vmem>>, vector<1x32x256xf32>,
    %142 = vector.extract_strided_slice %110 {offsets = [5, 0], sizes = [1, 256], strides = [1, 1]} : vector<8x256xf32> to vector<1x256xf32>
    %143 = vector.broadcast %142 : vector<1x256xf32> to vector<32x256xf32>
    %144 = arith.mulf %143, %111 : vector<32x256xf32>
    %c5_50 = arith.constant 5 : index
    %c32_51 = arith.constant 32 : index
    %c0_52 = arith.constant 0 : index
    %145 = vector.load %arg5[%c5_50, %c32_51, %c0_52] : memref<8x64x256xf32, #tpu.memory_space<vmem>>, vector<1x32x256xf32>
    %146 = vector.shape_cast %145 : vector<1x32x256xf32> to vector<32x256xf32>
    %147 = vector.shape_cast %144 : vector<32x256xf32> to vector<1x32x256xf32>
    tpu.vector_store %arg5[%c5_50, %c32_51, %c0_52], %147 {strides = array<i32>} : memref<8x64x256xf32, #tpu.memory_space<vmem>>, vector<1x32x256xf32>,
    %148 = vector.extract_strided_slice %110 {offsets = [6, 0], sizes = [1, 256], strides = [1, 1]} : vector<8x256xf32> to vector<1x256xf32>
    %149 = vector.broadcast %148 : vector<1x256xf32> to vector<32x256xf32>
    %150 = arith.mulf %149, %111 : vector<32x256xf32>
    %c6_53 = arith.constant 6 : index
    %c32_54 = arith.constant 32 : index
    %c0_55 = arith.constant 0 : index
    %151 = vector.load %arg5[%c6_53, %c32_54, %c0_55] : memref<8x64x256xf32, #tpu.memory_space<vmem>>, vector<1x32x256xf32>
    %152 = vector.shape_cast %151 : vector<1x32x256xf32> to vector<32x256xf32>
    %153 = vector.shape_cast %150 : vector<32x256xf32> to vector<1x32x256xf32>
    tpu.vector_store %arg5[%c6_53, %c32_54, %c0_55], %153 {strides = array<i32>} : memref<8x64x256xf32, #tpu.memory_space<vmem>>, vector<1x32x256xf32>,
    %154 = vector.extract_strided_slice %110 {offsets = [7, 0], sizes = [1, 256], strides = [1, 1]} : vector<8x256xf32> to vector<1x256xf32>
    %155 = vector.broadcast %154 : vector<1x256xf32> to vector<32x256xf32>
    %156 = arith.mulf %155, %111 : vector<32x256xf32>
    %c7_56 = arith.constant 7 : index
    %c32_57 = arith.constant 32 : index
    %c0_58 = arith.constant 0 : index
    %157 = vector.load %arg5[%c7_56, %c32_57, %c0_58] : memref<8x64x256xf32, #tpu.memory_space<vmem>>, vector<1x32x256xf32>
    %158 = vector.shape_cast %157 : vector<1x32x256xf32> to vector<32x256xf32>
    %159 = vector.shape_cast %156 : vector<32x256xf32> to vector<1x32x256xf32>
    tpu.vector_store %arg5[%c7_56, %c32_57, %c0_58], %159 {strides = array<i32>} : memref<8x64x256xf32, #tpu.memory_space<vmem>>, vector<1x32x256xf32>,
    %cst_59 = arith.constant 5.000000e-01 : f32
    %160 = vector.broadcast %cst_59 : f32 to vector<8x256xf32>
    %161 = arith.mulf %101, %160 : vector<8x256xf32>
    %c0_60 = arith.constant 0 : index
    %c0_61 = arith.constant 0 : index
    %162 = vector.load %arg6[%c0_60, %c0_61] : memref<8x256xf32, #tpu.memory_space<vmem>>, vector<8x256xf32>
    tpu.vector_store %arg6[%c0_60, %c0_61], %161 {strides = array<i32>} : memref<8x256xf32, #tpu.memory_space<vmem>>, vector<8x256xf32>,
    return
  }
  func.func @transform_0(%arg0: i32) -> (i32, i32) {
    %c0_i32 = arith.constant 0 : i32
    %c0_i32_0 = arith.constant 0 : i32
    return %arg0, %c0_i32 : i32, i32
  }
  func.func @transform_1(%arg0: i32) -> (i32, i32) {
    %c0_i32 = arith.constant 0 : i32
    %c0_i32_0 = arith.constant 0 : i32
    return %c0_i32, %arg0 : i32, i32
  }
  func.func @transform_2(%arg0: i32) -> (i32, i32) {
    %c0_i32 = arith.constant 0 : i32
    %c0_i32_0 = arith.constant 0 : i32
    %c0_i32_1 = arith.constant 0 : i32
    return %c0_i32, %c0_i32_0 : i32, i32
  }
  func.func @transform_3(%arg0: i32) -> (i32, i32) {
    %c0_i32 = arith.constant 0 : i32
    %c0_i32_0 = arith.constant 0 : i32
    %c0_i32_1 = arith.constant 0 : i32
    return %c0_i32, %c0_i32_0 : i32, i32
  }
  func.func @transform_4(%arg0: i32) -> (i32, i32, i32) {
    %c0_i32 = arith.constant 0 : i32
    %c0_i32_0 = arith.constant 0 : i32
    %c0_i32_1 = arith.constant 0 : i32
    return %c0_i32, %c0_i32_0, %arg0 : i32, i32, i32
  }
  func.func @transform_5(%arg0: i32) -> (i32, i32) {
    %c0_i32 = arith.constant 0 : i32
    %c0_i32_0 = arith.constant 0 : i32
    return %c0_i32, %arg0 : i32, i32
  }
}

</mosaic_0001>

<bundles_post_ra>
// kernel: tree_track_builder.1
= control target key start
LH: loop header
LB: loop body
LE: loop exit
PB: predicated region body
PF: predicated region fallthrough
CT: control target
= control target key end

     0   :  { %11 = vsyncpa [#allocation3], 0  ;;  %vm125_vm0 = vcmask 261120   ;;  %v1186_v7 = vmov 0   ;;  %s1834_s0 = inlined_call_operand.vmem [shape: f32[256,32], index: 0, kind: input, shape index: {}]   ;;  %s1835_s1 = inlined_call_operand.vmem [shape: f32[1,256], index: 1, kind: input, shape index: {}]   ;;  %s1836_s2 = inlined_call_operand.vmem [shape: f32[80,32], index: 2, kind: input, shape index: {}]   ;;  %s1837_s3 = inlined_call_operand.vmem [shape: f32[80,1], index: 3, kind: input, shape index: {}]   ;;  %s1838_s4 = inlined_call_operand.hbm [shape: f32[8,64,256], index: 4, kind: output, shape index: {0}]   ;;  %s1839_s5 = inlined_call_operand.hbm [shape: f32[8,256], index: 5, kind: output, shape index: {1}]  }
   0x1   :  { %v37_v0 = vld [vmem:[%s1834_s0 + $0x80] sm:$0xff]  ;;  %v38_v1 = vld [vmem:[%s1834_s0 + $0x88] sm:$0xff]  ;;  %vm1232_vm1 = vmpackc.low %vm125_vm0, %vm125_vm0  ;;  %1105 = vset.pattern.permute.xlu1 %v1186_v7  ;;  %1104 = vset.pattern.permute.xlu0 %v1186_v7 }
   0x2   :  { %v21_v2 = vld [vmem:[%s1834_s0] sm:$0xff]  ;;  %v1035_v3 = vpack.c.bf16 %v38_v1, %v37_v0  ;;  %v22_v5 = vld [vmem:[%s1834_s0 + $0x8] sm:$0xff]  ;;  %v39_v6 = vld [vmem:[%s1834_s0 + $0x90] sm:$0xff] }
   0x3   :  { %v1038_v8 = vpack.c.bf16 %v22_v5, %v21_v2  ;;  %v40_v9 = vld [vmem:[%s1834_s0 + $0x98] sm:$0xff]  ;;  %v23_v11 = vld [vmem:[%s1834_s0 + $0x10] sm:$0xff]  ;;  %v41_v13 = vld [vmem:[%s1834_s0 + $0xa0] sm:$0xff] }
   0x4   :  { %1037 = vmatprep.subr.msk.bf16.mxu0 %vm1232_vm1, %v1035_v3  ;;  %1083 = vmatprep.subr.msk.bf16.mxu1 %vm1232_vm1, %v1035_v3  ;;  %v1041_v10 = vpack.c.bf16 %v40_v9, %v39_v6  ;;  %v24_v12 = vld [vmem:[%s1834_s0 + $0x18] sm:$0xff]  ;;  %v42_v14 = vld [vmem:[%s1834_s0 + $0xa8] sm:$0xff]  ;;  %v1274_v17 = vld [vmem:[%s1836_s2] sm:$0xff] }
   0x5   :  { %1040 = vmatpush3.bf16.xpose.msk.msra.mxu0 %vm1232_vm1, %v1038_v8  ;;  %1091 = vmatpush3.bf16.xpose.msk.msra.mxu1 %vm1232_vm1, %v1038_v8  ;;  %v1044_v15 = vpack.c.bf16 %v24_v12, %v23_v11  ;;  %v1047_v16 = vpack.c.bf16 %v42_v14, %v41_v13  ;;  %v1279_v18 = vld [vmem:[%s1836_s2 + $0x28] sm:$0xff]  ;;  %v25_v19 = vld [vmem:[%s1834_s0 + $0x20] sm:$0xff]  ;;  %v43_v21 = vld [vmem:[%s1834_s0 + $0xb0] sm:$0xff] }
   0x6   :  { %1043 = vmatprep.subr.msk.bf16.mxu0 %vm1232_vm1, %v1041_v10  ;;  %1084 = vmatprep.subr.msk.bf16.mxu1 %vm1232_vm1, %v1041_v10  ;;  %v26_v20 = vld [vmem:[%s1834_s0 + $0x28] sm:$0xff]  ;;  %v44_v22 = vld [vmem:[%s1834_s0 + $0xb8] sm:$0xff]  ;;  %v73_v23 = vld [vmem:[%s1837_s3 + $0x40] sm:$0xff] }
   0x7   :  { %1015 = vmatprep.mubr.msk.f32.mxu0 %vm125_vm0, %v1274_v17  ;;  %1025 = vmatprep.mubr.msk.f32.mxu1 %vm125_vm0, %v1279_v18  ;;  %v65_v24 = vld [vmem:[%s1837_s3] sm:$0xff]  ;;  %v1050_v25 = vpack.c.bf16 %v26_v20, %v25_v19  ;;  %v74_v26 = vld [vmem:[%s1837_s3 + $0x48] sm:$0xff]  ;;  %v1053_v27 = vpack.c.bf16 %v44_v22, %v43_v21 }
   0x8   :  { %117 = vperm.xlu0 %1104, %v73_v23   ;;  %77 = vperm.xlu1 %1105, %v65_v24  }
   0xd   :  { %1046 = vmatpush3.bf16.xpose.msk.msra.mxu0 %vm1232_vm1, %v1044_v15  ;;  %1092 = vmatpush3.bf16.xpose.msk.msra.mxu1 %vm1232_vm1, %v1044_v15 }
   0xe   :  { %1049 = vmatprep.subr.msk.bf16.mxu0 %vm1232_vm1, %v1047_v16  ;;  %1085 = vmatprep.subr.msk.bf16.mxu1 %vm1232_vm1, %v1047_v16 }
   0xf   :  { %12 = vsyncpa [#allocation5], 0  ;;  %122 = vperm.xlu0 %1104, %v74_v26   ;;  %v66_v28 = vld [vmem:[%s1837_s3 + $0x8] sm:$0xff]  ;;  %v67_v29 = vld [vmem:[%s1837_s3 + $0x10] sm:$0xff] }
  0x10   :  { %v27_v30 = vld [vmem:[%s1834_s0 + $0x30] sm:$0xff]  ;;  %v28_v31 = vld [vmem:[%s1834_s0 + $0x38] sm:$0xff]  ;;  %v45_v32 = vld [vmem:[%s1834_s0 + $0xc0] sm:$0xff]  ;;  %82 = vperm.xlu1 %1105, %v66_v28  }
  0x11   :  { %v46_v33 = vld [vmem:[%s1834_s0 + $0xc8] sm:$0xff]  ;;  %v68_v34 = vld [vmem:[%s1837_s3 + $0x18] sm:$0xff]  ;;  %v1056_v35 = vpack.c.bf16 %v28_v31, %v27_v30  ;;  %v69_v36 = vld [vmem:[%s1837_s3 + $0x20] sm:$0xff] }
  0x12   :  { %v1059_v37 = vpack.c.bf16 %v46_v33, %v45_v32  ;;  %v70_v38 = vld [vmem:[%s1837_s3 + $0x28] sm:$0xff]  ;;  %v71_v39 = vld [vmem:[%s1837_s3 + $0x30] sm:$0xff]  ;;  %v29_v40 = vld [vmem:[%s1834_s0 + $0x40] sm:$0xff] }
  0x13   :  { %87 = vperm.xlu0 %1104, %v67_v29   ;;  %v30_v41 = vld [vmem:[%s1834_s0 + $0x48] sm:$0xff]  ;;  %v47_v42 = vld [vmem:[%s1834_s0 + $0xd0] sm:$0xff]  ;;  %v48_v43 = vld [vmem:[%s1834_s0 + $0xd8] sm:$0xff] }
  0x14   :  { %92 = vperm.xlu1 %1105, %v68_v34   ;;  %v72_v44 = vld [vmem:[%s1837_s3 + $0x38] sm:$0xff]  ;;  %v1062_v45 = vpack.c.bf16 %v30_v41, %v29_v40  ;;  %v1065_v46 = vpack.c.bf16 %v48_v43, %v47_v42  ;;  %v31_v47 = vld [vmem:[%s1834_s0 + $0x50] sm:$0xff]  ;;  %v49_v49 = vld [vmem:[%s1834_s0 + $0xe0] sm:$0xff] }
  0x15   :  { %1052 = vmatpush3.bf16.xpose.msk.msra.mxu0 %vm1232_vm1, %v1050_v25  ;;  %1093 = vmatpush3.bf16.xpose.msk.msra.mxu1 %vm1232_vm1, %v1050_v25  ;;  %v32_v48 = vld [vmem:[%s1834_s0 + $0x58] sm:$0xff]  ;;  %v50_v50 = vld [vmem:[%s1834_s0 + $0xe8] sm:$0xff]  ;;  %v33_v53 = vld [vmem:[%s1834_s0 + $0x60] sm:$0xff] }
  0x16   :  { %1055 = vmatprep.subr.msk.bf16.mxu0 %vm1232_vm1, %v1053_v27  ;;  %1086 = vmatprep.subr.msk.bf16.mxu1 %vm1232_vm1, %v1053_v27  ;;  %v1068_v51 = vpack.c.bf16 %v32_v48, %v31_v47  ;;  %v1071_v52 = vpack.c.bf16 %v50_v50, %v49_v49  ;;  %v34_v54 = vld [vmem:[%s1834_s0 + $0x68] sm:$0xff]  ;;  %v51_v55 = vld [vmem:[%s1834_s0 + $0xf0] sm:$0xff]  ;;  %v52_v56 = vld [vmem:[%s1834_s0 + $0xf8] sm:$0xff] }
  0x17   :  { %97 = vperm.xlu0 %1104, %v69_v36   ;;  %v1074_v57 = vpack.c.bf16 %v34_v54, %v33_v53  ;;  %v1077_v58 = vpack.c.bf16 %v52_v56, %v51_v55  ;;  %v35_v59 = vld [vmem:[%s1834_s0 + $0x70] sm:$0xff]  ;;  %v36_v60 = vld [vmem:[%s1834_s0 + $0x78] sm:$0xff]  ;;  %v56_v62 = vld [vmem:[%s1836_s2 + $0x8] sm:$0xff] }
  0x18   :  { %102 = vperm.xlu1 %1105, %v70_v38   ;;  %v1080_v61 = vpack.c.bf16 %v36_v60, %v35_v59  ;;  %v61_v63 = vld [vmem:[%s1836_s2 + $0x30] sm:$0xff]  ;;  %v62_v1 = vld [vmem:[%s1836_s2 + $0x38] sm:$0xff]  ;;  %v63_v3 = vld [vmem:[%s1836_s2 + $0x40] sm:$0xff] }
  0x19   :  { %v57_v0 = vld [vmem:[%s1836_s2 + $0x10] sm:$0xff]  ;;  %v58_v2 = vld [vmem:[%s1836_s2 + $0x18] sm:$0xff]  ;;  %v59_v4 = vld [vmem:[%s1836_s2 + $0x20] sm:$0xff] }
  0x1a   :  { %v64_v5 = vld [vmem:[%s1836_s2 + $0x48] sm:$0xff] }
  0x1b   :  { %107 = vperm.xlu0 %1104, %v71_v39  }
  0x1c   :  { %112 = vperm.xlu1 %1105, %v72_v44  }
  0x1d   :  { %1058 = vmatpush3.bf16.xpose.msk.msra.mxu0 %vm1232_vm1, %v1056_v35  ;;  %1094 = vmatpush3.bf16.xpose.msk.msra.mxu1 %vm1232_vm1, %v1056_v35 }
  0x1e   :  { %1061 = vmatprep.subr.msk.bf16.mxu0 %vm1232_vm1, %v1059_v37  ;;  %1087 = vmatprep.subr.msk.bf16.mxu1 %vm1232_vm1, %v1059_v37 }
  0x25   :  { %1064 = vmatpush3.bf16.xpose.msk.msra.mxu0 %vm1232_vm1, %v1062_v45  ;;  %1095 = vmatpush3.bf16.xpose.msk.msra.mxu1 %vm1232_vm1, %v1062_v45 }
  0x26   :  { %1067 = vmatprep.subr.msk.bf16.mxu0 %vm1232_vm1, %v1065_v46  ;;  %1088 = vmatprep.subr.msk.bf16.mxu1 %vm1232_vm1, %v1065_v46 }
  0x2d   :  { %1070 = vmatpush3.bf16.xpose.msk.msra.mxu0 %vm1232_vm1, %v1068_v51  ;;  %1096 = vmatpush3.bf16.xpose.msk.msra.mxu1 %vm1232_vm1, %v1068_v51 }
  0x2e   :  { %1073 = vmatprep.subr.msk.bf16.mxu0 %vm1232_vm1, %v1071_v52  ;;  %1089 = vmatprep.subr.msk.bf16.mxu1 %vm1232_vm1, %v1071_v52 }
  0x35   :  { %1076 = vmatpush3.bf16.xpose.msk.msra.mxu0 %vm1232_vm1, %v1074_v57  ;;  %1097 = vmatpush3.bf16.xpose.msk.msra.mxu1 %vm1232_vm1, %v1074_v57 }
  0x36   :  { %1079 = vmatprep.subr.msk.bf16.mxu0 %vm1232_vm1, %v1077_v58  ;;  %1090 = vmatprep.subr.msk.bf16.mxu1 %vm1232_vm1, %v1077_v58 }
  0x3d   :  { %1082 = vmatpush3.bf16.xpose.msk.msra.mxu0 %vm1232_vm1, %v1080_v61  ;;  %1098 = vmatpush3.bf16.xpose.msk.msra.mxu1 %vm1232_vm1, %v1080_v61 }
  0x44   :  { %1016 = vmatmul.mubr.msk.f32.vlgmr.msra.gmra.mrb[0].mxu0 %vm125_vm0, %v1274_v17  ;;  %1026 = vmatmul.mubr.msk.f32.vlgmr.msra.gmra.mrb[0].mxu1 %vm125_vm0, %v1279_v18 }
  0x45   :  { %1017 = vmatprep.mubr.msk.f32.mxu0 %vm125_vm0, %v56_v62  ;;  %1027 = vmatprep.mubr.msk.f32.mxu1 %vm125_vm0, %v61_v63 }
  0x48   :  { %1018 = vmatmul.mubr.msk.f32.gmra.mrb[2].mxu0 %vm125_vm0, %v56_v62  ;;  %1028 = vmatmul.mubr.msk.f32.gmra.mrb[2].mxu1 %vm125_vm0, %v61_v63 }
  0x49   :  { %1019 = vmatprep.mubr.msk.f32.mxu0 %vm125_vm0, %v57_v0  ;;  %1029 = vmatprep.mubr.msk.f32.mxu1 %vm125_vm0, %v62_v1 }
  0x4c   :  { %1020 = vmatmul.mubr.msk.f32.gmra.mrb[4].mxu0 %vm125_vm0, %v57_v0  ;;  %1030 = vmatmul.mubr.msk.f32.gmra.mrb[4].mxu1 %vm125_vm0, %v62_v1 }
  0x4d   :  { %1021 = vmatprep.mubr.msk.f32.mxu0 %vm125_vm0, %v58_v2  ;;  %1031 = vmatprep.mubr.msk.f32.mxu1 %vm125_vm0, %v63_v3 }
  0x50   :  { %1022 = vmatmul.mubr.msk.f32.gmra.mrb[6].mxu0 %vm125_vm0, %v58_v2  ;;  %1032 = vmatmul.mubr.msk.f32.gmra.mrb[6].mxu1 %vm125_vm0, %v63_v3 }
  0x51   :  { %1023 = vmatprep.mubr.msk.f32.mxu0 %vm125_vm0, %v59_v4  ;;  %1033 = vmatprep.mubr.msk.f32.mxu1 %vm125_vm0, %v64_v5 }
  0x54   :  { %1024 = vmatmul.mubr.msk.f32.gmra.mrb[8].mxu0 %vm125_vm0, %v59_v4  ;;  %1034 = vmatmul.mubr.msk.f32.gmra.mrb[8].mxu1 %vm125_vm0, %v64_v5 }
  0x87   :  { %v118_v15 = vpop.permute.xlu0 %117 }
  0x8e   :  { %v123_v26 = vpop.permute.xlu0 %122 }
 0x117   :  { %v1477_v6 = vpop.f32.mrb[0].mxu1  ;;  %v1479_v8 = vpop.f32.mrb[0].mxu0 }
 0x118   :  { %v1481_v9 = vpop.f32.mrb[1].mxu1  ;;  %v1483_v10 = vpop.f32.mrb[1].mxu0 }
 0x11b   :  { %v1485_v11 = vpop.f32.mrb[2].mxu1  ;;  %v1487_v12 = vpop.f32.mrb[2].mxu0 }
 0x11c   :  { %v1489_v13 = vpop.f32.mrb[3].mxu1  ;;  %v1491_v14 = vpop.f32.mrb[3].mxu0 }
 0x11f   :  { %v1493_v16 = vpop.f32.mrb[4].mxu1  ;;  %v1495_v17 = vpop.f32.mrb[4].mxu0 }
 0x120   :  { %v1497_v18 = vpop.f32.mrb[5].mxu1  ;;  %v1499_v19 = vpop.f32.mrb[5].mxu0 }
 0x123   :  { %v366_v20 = vpop.f32.mrb[6].mxu1  ;;  %v1501_v21 = vpop.f32.mrb[6].mxu0 }
 0x124   :  { %v367_v22 = vadd.f32 %v366_v20, %v118_v15  ;;  %v368_v23 = vpop.f32.mrb[7].mxu1  ;;  %v1503_v24 = vpop.f32.mrb[7].mxu0 }
 0x125   :  { %v369_v25 = vadd.f32 %v368_v23, %v118_v15 }
 0x126   :  { %v377_v27 = vrot.slane %v367_v22, 4 }
 0x127   :  { %v383_v28 = vrot.slane %v369_v25, 4  ;;  %v1505_v29 = vpop.f32.mrb[8].mxu0  ;;  %v372_v30 = vpop.f32.mrb[8].mxu1 }
 0x128   :  { %v378_v31 = vmax.f32 %v367_v22, %v377_v27  ;;  %v373_v32 = vadd.f32 %v372_v30, %v123_v26  ;;  %v1507_v33 = vpop.f32.mrb[9].mxu0  ;;  %v374_v34 = vpop.f32.mrb[9].mxu1 }
 0x129   :  { %v384_v35 = vmax.f32 %v369_v25, %v383_v28  ;;  %v375_v36 = vadd.f32 %v374_v34, %v123_v26  ;;  %v412_v28 = vlaneseq }
 0x12a   :  { %v379_v37 = vrot.slane %v378_v31, 2  ;;  %v651_v38 = vrot.slane %v373_v32, 4 }
 0x12b   :  { %v385_v39 = vrot.slane %v384_v35, 2  ;;  %v657_v40 = vrot.slane %v375_v36, 4 }
 0x12c   :  { %v380_v41 = vmax.f32 %v378_v31, %v379_v37  ;;  %v652_v42 = vmax.f32 %v373_v32, %v651_v38  ;;  %v53_v37 = vld [vmem:[%s1835_s1] sm:$0x3]  ;;  %s1187_s1 = smov [#allocation4]  }
 0x12d   :  { %v386_v43 = vmax.f32 %v384_v35, %v385_v39  ;;  %v658_v44 = vmax.f32 %v375_v36, %v657_v40  ;;  %v1512_v40 = vshrl.u32 %v412_v28, 7  ;;  %vm54_vm2 = vcmp.gt.f32.partialorder %v53_v37, 0.5  ;;  %s929_s20 = sshll.u32 %s1187_s1, 4  ;;  %s930_s20 = int_to_ptr.vmem [resolvable:$true] %s929_s20 }
 0x12e   :  { %v381_v45 = vrot.slane %v380_v41, 1  ;;  %v653_v46 = vrot.slane %v652_v42, 2  ;;  %s1138_s21 = scalar_lea.vmem %s930_s20, 256  ;;  %p1143_p1 = scmp.lt.s32.totalorder %s930_s20, %s930_s20 }
 0x12f   :  { %v387_v47 = vrot.slane %v386_v43, 1  ;;  %v659_v48 = vrot.slane %v658_v44, 2  ;;  %p1139_p0 = scmp.ne.s32.totalorder %s930_s20, %s1138_s21  ;;  %p1144_p2 = scmp.lt.s32.totalorder %s1138_s21, %s1138_s21 }
 0x130   :  { %v382_v49 = vmax.f32 %v380_v41, %v381_v45  ;;  %v654_v50 = vmax.f32 %v652_v42, %v653_v46 }
 0x131   :  { %v388_v51 = vmax.f32 %v386_v43, %v387_v47  ;;  %v660_v52 = vmax.f32 %v658_v44, %v659_v48  ;;  %v1515_v47 = vsub.s32 0, %v1512_v40  ;;  %p1145_p3 = por %p1144_p2, %p1143_p1 }
 0x132   :  { %v389_v53 = vsub.f32 %v367_v22, %v382_v49  ;;  %v655_v54 = vrot.slane %v654_v50, 1  ;;  %v1518_v49 = vsub.s32 1, %v1512_v40 }
 0x133   :  { %v390_v55 = vsub.f32 %v369_v25, %v388_v51  ;;  %v661_v56 = vrot.slane %v660_v52, 1  ;;  %p1146_p4 = pnand %p1145_p3, %p1139_p0 }
 0x134   :  { %v391_v57 = vmul.f32 1.442695, %v389_v53  ;;  %v656_v58 = vmax.f32 %v654_v50, %v655_v54  ;;  %v411_v50 = vsel %vm54_vm2, 1, %v1186_v7 }
 0x135   :  { %v393_v59 = vmul.f32 1.442695, %v390_v55  ;;  %v662_v60 = vmax.f32 %v660_v52, %v661_v56  ;;  %v415_v52 = vrot.slane %v411_v50, %v1515_v47  ;;  %v419_v53 = vrot.slane %v411_v50, %v1518_v49 }
 0x136   :  { %1106 = vpow2.f32 %v391_v57  ;;  %v663_v61 = vsub.f32 %v373_v32, %v656_v58 }
 0x137   :  { %1108 = vpow2.f32 %v393_v59  ;;  %v664_v62 = vsub.f32 %v375_v36, %v662_v60  ;;  %vm420_vm3 = vcmp.eq.s32.totalorder %v415_v52, 1  ;;  %vm421_vm4 = vcmp.eq.s32.totalorder %v419_v53, 1 }
 0x138   :  { %v665_v63 = vmul.f32 1.442695, %v663_v61 }
 0x139   :  { %v667_v0 = vmul.f32 1.442695, %v664_v62 }
 0x13a   :  { %1110 = vpow2.f32 %v665_v63 }
 0x13b   :  { %1112 = vpow2.f32 %v667_v0 }
 0x140   :  { %v1107_v1 = vpop.eup %1106 }
 0x141   :  { %v1109_v2 = vpop.eup %1108  ;;  %v395_v3 = vrot.slane %v1107_v1, 4 }
 0x142   :  { %v401_v4 = vrot.slane %v1109_v2, 4 }
 0x143   :  { %v396_v5 = vadd.f32 %v1107_v1, %v395_v3 }
 0x144   :  { %v1111_v15 = vpop.eup %1110  ;;  %v402_v20 = vadd.f32 %v1109_v2, %v401_v4 }
 0x145   :  { %v1113_v22 = vpop.eup %1112  ;;  %v397_v23 = vrot.slane %v396_v5, 2  ;;  %v669_v25 = vrot.slane %v1111_v15, 4 }
 0x146   :  { %v403_v26 = vrot.slane %v402_v20, 2  ;;  %v675_v27 = vrot.slane %v1113_v22, 4 }
 0x147   :  { %v398_v30 = vadd.f32 %v397_v23, %v396_v5  ;;  %v670_v31 = vadd.f32 %v1111_v15, %v669_v25 }
 0x148   :  { %v404_v32 = vadd.f32 %v403_v26, %v402_v20  ;;  %v676_v34 = vadd.f32 %v1113_v22, %v675_v27 }
 0x149   :  { %v399_v35 = vrot.slane %v398_v30, 1  ;;  %v671_v36 = vrot.slane %v670_v31, 2 }
 0x14a   :  { %v405_v38 = vrot.slane %v404_v32, 1  ;;  %v677_v39 = vrot.slane %v676_v34, 2 }
 0x14b   :  { %v400_v41 = vadd.f32 %v399_v35, %v398_v30  ;;  %v672_v42 = vadd.f32 %v671_v36, %v670_v31 }
 0x14c   :  { %v406_v43 = vadd.f32 %v405_v38, %v404_v32  ;;  %v678_v44 = vadd.f32 %v677_v39, %v676_v34 }
 0x14d   :  { %1114 = vrcp.f32 %v400_v41  ;;  %v673_v45 = vrot.slane %v672_v42, 1 }
 0x14e   :  { %1116 = vrcp.f32 %v406_v43  ;;  %v679_v46 = vrot.slane %v678_v44, 1 }
 0x14f   :  { %v674_v48 = vadd.f32 %v673_v45, %v672_v42 }
 0x150   :  { %v680_v51 = vadd.f32 %v679_v46, %v678_v44 }
 0x151   :  { %1118 = vrcp.f32 %v674_v48 }
 0x152   :  { %1120 = vrcp.f32 %v680_v51 }
 0x157   :  { %v1115_v54 = vpop.eup %1114 }
 0x158   :  { %v1117_v55 = vpop.eup %1116  ;;  %v409_v56 = vmul.f32 %v1115_v54, %v1107_v1 }
 0x159   :  { %v410_v57 = vmul.f32 %v1117_v55, %v1109_v2 }
 0x15a   :  { %v1523_v58 = vsel %vm420_vm3, 0.125, %v409_v56 }
 0x15b   :  { %v1119_v59 = vpop.eup %1118  ;;  %v426_v60 = vadd.f32 1e-06, %v1523_v58  ;;  %v1526_v61 = vsel %vm421_vm4, 0.125, %v410_v57 }
 0x15c   :  { %v1121_v7 = vpop.eup %1120  ;;  %v427_v62 = vadd.f32 1e-06, %v1526_v61  ;;  %v683_v63 = vmul.f32 %v1119_v59, %v1111_v15 }
 0x15d   :  { %1122 = vlog2.f32 %v426_v60  ;;  %v684_v0 = vmul.f32 %v1121_v7, %v1113_v22 }
 0x15e   :  { %1124 = vlog2.f32 %v427_v62  ;;  %v1529_v3 = vsel %vm420_vm3, 0.125, %v683_v63 }
 0x15f   :  { %v689_v4 = vadd.f32 1e-06, %v1529_v3  ;;  %v1532_v1 = vsel %vm421_vm4, 0.125, %v684_v0  ;;  %v687_v2 = vadd.f32 %v1529_v3, %v1523_v58 }
 0x160   :  { %v690_v5 = vadd.f32 1e-06, %v1532_v1  ;;  %v688_v20 = vadd.f32 %v1532_v1, %v1526_v61 }
 0x161   :  { %1126 = vlog2.f32 %v689_v4  ;;  %v907_v15 = vmul.f32 0.5, %v687_v2 }
 0x162   :  { %1128 = vlog2.f32 %v690_v5  ;;  %v908_v22 = vmul.f32 0.5, %v688_v20 }
 0x163   :  { %909 = vst [vmem:[#allocation4] sm:$0xff] %v907_v15 }
 0x164   :  { %910 = vst [vmem:[#allocation4 + $0x8] sm:$0xff] %v908_v22 }
 0x165   :  { %1149 = shalt.err (!%p1146_p4)
}
 0x166   :  { %s1150_s24 = scalar_lea.hbm %s1839_s5, 256 }
 0x167   :  { %p1151_p5 = scmp.ne.s32.totalorder %s1839_s5, %s1150_s24  ;;  %p1154_p6 = scmp.lt.u32.totalorder %s1150_s24, %s1839_s5 }
 0x169   :  { %p1156_p7 = pnand %p1154_p6, %p1151_p5 }
 0x16b   :  { %1159 = shalt.err (!%p1156_p7)
}
 0x16c   :  { %932 = dma.vmem_to_hbm [thread:$0]  %s930_s20, 256, %s1839_s5, [#allocation5]   ;;  %v1123_v23 = vpop.eup %1122  ;;  %v78_v38 = vpop.permute.xlu1 %77 }
 0x16d   :  { %v1125_v25 = vpop.eup %1124  ;;  %v429_v26 = vmul.f32 0.6931472, %v1123_v23  ;;  %s1188_s5 = smov [#allocation2]  }
 0x16e   :  { %v431_v27 = vmul.f32 0.6931472, %v1125_v25  ;;  %v1127_v30 = vpop.eup %1126  ;;  %v1556_v25 = vsub.s32 2, %v1512_v40  ;;  %s916_s6 = sshll.u32 %s1188_s5, 4  ;;  %s1811_s6 = int_to_ptr.vmem [resolvable:$true] %s916_s6 }
 0x16f   :  { %v432_v28 = vmul.f32 %v429_v26, %v1523_v58  ;;  %v1129_v32 = vpop.eup %1128  ;;  %v692_v35 = vmul.f32 0.6931472, %v1127_v30  ;;  %v1565_v30 = vsub.s32 5, %v1512_v40  ;;  %s1160_s7 = scalar_lea.vmem %s1811_s6, 16384  ;;  %p1165_p9 = scmp.lt.s32.totalorder %s1811_s6, %s1811_s6 }
 0x170   :  { %v433_v31 = vmul.f32 %v431_v27, %v1526_v61  ;;  %v694_v37 = vmul.f32 0.6931472, %v1129_v32  ;;  %v83_v54 = vpop.permute.xlu1 %82  ;;  %v1559_v27 = vsub.s32 3, %v1512_v40  ;;  %p1161_p8 = scmp.ne.s32.totalorder %s1811_s6, %s1160_s7  ;;  %p1166_p10 = scmp.lt.s32.totalorder %s1160_s7, %s1160_s7 }
 0x171   :  { %v434_v34 = vrot.slane %v432_v28, 4  ;;  %v695_v41 = vmul.f32 %v692_v35, %v1529_v3  ;;  %v1574_v35 = vsub.s32 6, %v1512_v40 }
 0x172   :  { %v440_v36 = vrot.slane %v433_v31, 4  ;;  %v696_v43 = vmul.f32 %v694_v37, %v1532_v1  ;;  %p1167_p11 = por %p1166_p10, %p1165_p9 }
 0x173   :  { %v435_v39 = vadd.f32 %v434_v34, %v432_v28  ;;  %v697_v45 = vrot.slane %v695_v41, 4  ;;  %v1562_v28 = vsub.s32 4, %v1512_v40  ;;  %v1571_v34 = vadd.f32 %v1479_v8, %v78_v38 }
 0x174   :  { %v441_v42 = vadd.f32 %v440_v36, %v433_v31  ;;  %v703_v48 = vrot.slane %v696_v43, 4  ;;  %v93_v5 = vpop.permute.xlu1 %92  ;;  %v1577_v36 = vsub.s32 7, %v1512_v40  ;;  %v1589_v8 = vadd.f32 %v1491_v14, %v83_v54  ;;  %p1168_p12 = pnand %p1167_p11, %p1161_p8 }
 0x175   :  { %v436_v44 = vrot.slane %v435_v39, 2  ;;  %v698_v51 = vadd.f32 %v697_v45, %v695_v41 }
 0x176   :  { %v442_v46 = vrot.slane %v441_v42, 2  ;;  %v704_v53 = vadd.f32 %v703_v48, %v696_v43 }
 0x177   :  { %v437_v50 = vadd.f32 %v436_v44, %v435_v39  ;;  %v699_v56 = vrot.slane %v698_v51, 2  ;;  %v88_v39 = vpop.permute.xlu0 %87 }
 0x178   :  { %v443_v52 = vadd.f32 %v442_v46, %v441_v42  ;;  %v705_v59 = vrot.slane %v704_v53, 2  ;;  %v103_v23 = vpop.permute.xlu1 %102  ;;  %v1583_v42 = vadd.f32 %v1483_v10, %v78_v38  ;;  %v1592_v44 = vadd.f32 %v1495_v17, %v88_v39 }
 0x179   :  { %v438_v55 = vrot.slane %v437_v50, 1  ;;  %v700_v7 = vadd.f32 %v699_v56, %v698_v51  ;;  %v1568_v32 = vadd.f32 %v1477_v6, %v103_v23  ;;  %v1580_v41 = vadd.f32 %v1481_v9, %v103_v23 }
 0x17a   :  { %v444_v57 = vrot.slane %v443_v52, 1  ;;  %v706_v63 = vadd.f32 %v705_v59, %v704_v53  ;;  %v1586_v6 = vadd.f32 %v1487_v12, %v83_v54  ;;  %v1596_v45 = vadd.f32 %v1499_v19, %v88_v39 }
 0x17b   :  { %v439_v60 = vadd.f32 %v438_v55, %v437_v50  ;;  %v701_v2 = vrot.slane %v700_v7, 1  ;;  %v1602_v10 = vadd.f32 %v1501_v21, %v93_v5  ;;  %v1605_v12 = vadd.f32 %v1503_v24, %v93_v5 }
 0x17c   :  { %v445_v62 = vadd.f32 %v444_v57, %v443_v52  ;;  %v707_v20 = vrot.slane %v706_v63, 1 }
 0x17d   :  { %v446_v0 = vmul.f32 1.442695, %v439_v60  ;;  %v702_v15 = vadd.f32 %v701_v2, %v700_v7 }
 0x17e   :  { %v448_v4 = vmul.f32 1.442695, %v445_v62  ;;  %v708_v22 = vadd.f32 %v707_v20, %v706_v63 }
 0x17f   :  { %1130 = vpow2.f32 %v446_v0  ;;  %v709_v26 = vmul.f32 1.442695, %v702_v15 }
 0x180   :  { %1132 = vpow2.f32 %v448_v4  ;;  %v711_v31 = vmul.f32 1.442695, %v708_v22 }
 0x181   :  { %1134 = vpow2.f32 %v709_v26 }
 0x182   :  { %1136 = vpow2.f32 %v711_v31 }
 0x189   :  { %v1131_v37 = vpop.eup %1130 }
 0x18a   :  { %v1133_v43 = vpop.eup %1132  ;;  %v450_v40 = vmul.f32 %v1131_v37, %v1523_v58 }
 0x18b   :  { %v1599_v9 = vmul.f32 %v1133_v43, %v1526_v61  ;;  %v1639_v31 = vpop.eup %1134 }
 0x18c   :  { %v455_v14 = vrot.slane %v450_v40, %v1515_v47  ;;  %v479_v17 = vrot.slane %v450_v40, %v1518_v49  ;;  %v504_v58 = vrot.slane %v450_v40, %v1556_v25  ;;  %v529_v19 = vrot.slane %v450_v40, %v1559_v27 }
 0x18d   :  { %v554_v38 = vrot.slane %v450_v40, %v1562_v28  ;;  %v579_v61 = vrot.slane %v450_v40, %v1565_v30  ;;  %v604_v46 = vrot.slane %v450_v40, %v1574_v35  ;;  %v629_v21 = vrot.slane %v450_v40, %v1577_v36 }
 0x18e   :  { %v460_v24 = vmul.f32 %v455_v14, %v1571_v34  ;;  %v462_v48 = vmul.f32 %v455_v14, %v1586_v6  ;;  %v464_v50 = vmul.f32 %v455_v14, %v1592_v44  ;;  %v466_v51 = vmul.f32 %v455_v14, %v1602_v10  ;;  %v1645_v14 = vpop.eup %1136 }
 0x18f   :  { %v484_v52 = vmul.f32 %v479_v17, %v1571_v34  ;;  %v486_v53 = vmul.f32 %v479_v17, %v1586_v6  ;;  %v488_v54 = vmul.f32 %v479_v17, %v1592_v44  ;;  %v490_v55 = vmul.f32 %v479_v17, %v1602_v10 }
 0x190   :  { %468 = vst [vmem:[#allocation2] sm:$0xff] %v460_v24  ;;  %470 = vst [vmem:[#allocation2 + $0x10] sm:$0xff] %v462_v48  ;;  %v509_v56 = vmul.f32 %v504_v58, %v1571_v34  ;;  %v511_v57 = vmul.f32 %v504_v58, %v1586_v6  ;;  %v513_v59 = vmul.f32 %v504_v58, %v1592_v44 }
 0x191   :  { %472 = vst [vmem:[#allocation2 + $0x20] sm:$0xff] %v464_v50  ;;  %474 = vst [vmem:[#allocation2 + $0x30] sm:$0xff] %v466_v51  ;;  %v515_v60 = vmul.f32 %v504_v58, %v1602_v10  ;;  %v534_v7 = vmul.f32 %v529_v19, %v1571_v34  ;;  %v536_v62 = vmul.f32 %v529_v19, %v1586_v6 }
 0x192   :  { %493 = vst [vmem:[#allocation2 + $0x80] sm:$0xff] %v484_v52  ;;  %495 = vst [vmem:[#allocation2 + $0x90] sm:$0xff] %v486_v53  ;;  %v538_v63 = vmul.f32 %v529_v19, %v1592_v44  ;;  %v540_v0 = vmul.f32 %v529_v19, %v1602_v10  ;;  %v559_v4 = vmul.f32 %v554_v38, %v1571_v34 }
 0x193   :  { %497 = vst [vmem:[#allocation2 + $0xa0] sm:$0xff] %v488_v54  ;;  %499 = vst [vmem:[#allocation2 + $0xb0] sm:$0xff] %v490_v55  ;;  %v561_v2 = vmul.f32 %v554_v38, %v1586_v6  ;;  %v563_v5 = vmul.f32 %v554_v38, %v1592_v44  ;;  %v565_v20 = vmul.f32 %v554_v38, %v1602_v10 }
 0x194   :  { %518 = vst [vmem:[#allocation2 + $0x100] sm:$0xff] %v509_v56  ;;  %520 = vst [vmem:[#allocation2 + $0x110] sm:$0xff] %v511_v57  ;;  %v584_v15 = vmul.f32 %v579_v61, %v1571_v34  ;;  %v586_v22 = vmul.f32 %v579_v61, %v1586_v6  ;;  %v588_v23 = vmul.f32 %v579_v61, %v1592_v44 }
 0x195   :  { %522 = vst [vmem:[#allocation2 + $0x120] sm:$0xff] %v513_v59  ;;  %524 = vst [vmem:[#allocation2 + $0x130] sm:$0xff] %v515_v60  ;;  %v590_v26 = vmul.f32 %v579_v61, %v1602_v10  ;;  %v609_v37 = vmul.f32 %v604_v46, %v1571_v34  ;;  %v611_v39 = vmul.f32 %v604_v46, %v1586_v6 }
 0x196   :  { %543 = vst [vmem:[#allocation2 + $0x180] sm:$0xff] %v534_v7  ;;  %545 = vst [vmem:[#allocation2 + $0x190] sm:$0xff] %v536_v62  ;;  %v613_v43 = vmul.f32 %v604_v46, %v1592_v44  ;;  %v615_v40 = vmul.f32 %v604_v46, %v1602_v10  ;;  %v634_v17 = vmul.f32 %v629_v21, %v1571_v34 }
 0x197   :  { %547 = vst [vmem:[#allocation2 + $0x1a0] sm:$0xff] %v538_v63  ;;  %549 = vst [vmem:[#allocation2 + $0x1b0] sm:$0xff] %v540_v0  ;;  %v636_v58 = vmul.f32 %v629_v21, %v1586_v6  ;;  %v638_v19 = vmul.f32 %v629_v21, %v1592_v44  ;;  %v640_v38 = vmul.f32 %v629_v21, %v1602_v10  ;;  %v1659_v6 = vpop.permute.xlu0 %97 }
 0x198   :  { %568 = vst [vmem:[#allocation2 + $0x200] sm:$0xff] %v559_v4  ;;  %570 = vst [vmem:[#allocation2 + $0x210] sm:$0xff] %v561_v2  ;;  %v459_v61 = vrot.slane %v1599_v9, %v1515_v47  ;;  %v483_v46 = vrot.slane %v1599_v9, %v1518_v49  ;;  %v508_v24 = vrot.slane %v1599_v9, %v1556_v25 }
 0x199   :  { %572 = vst [vmem:[#allocation2 + $0x220] sm:$0xff] %v563_v5  ;;  %574 = vst [vmem:[#allocation2 + $0x230] sm:$0xff] %v565_v20  ;;  %v533_v34 = vrot.slane %v1599_v9, %v1559_v27  ;;  %v558_v44 = vrot.slane %v1599_v9, %v1562_v28  ;;  %v583_v10 = vrot.slane %v1599_v9, %v1565_v30 }
 0x19a   :  { %593 = vst [vmem:[#allocation2 + $0x280] sm:$0xff] %v584_v15  ;;  %595 = vst [vmem:[#allocation2 + $0x290] sm:$0xff] %v586_v22  ;;  %v608_v21 = vrot.slane %v1599_v9, %v1574_v35  ;;  %v633_v48 = vrot.slane %v1599_v9, %v1577_v36  ;;  %v461_v50 = vmul.f32 %v459_v61, %v1583_v42 }
 0x19b   :  { %597 = vst [vmem:[#allocation2 + $0x2a0] sm:$0xff] %v588_v23  ;;  %599 = vst [vmem:[#allocation2 + $0x2b0] sm:$0xff] %v590_v26  ;;  %v463_v51 = vmul.f32 %v459_v61, %v1589_v8  ;;  %v465_v52 = vmul.f32 %v459_v61, %v1596_v45  ;;  %v467_v53 = vmul.f32 %v459_v61, %v1605_v12  ;;  %v108_v22 = vpop.permute.xlu0 %107  ;;  %v113_v23 = vpop.permute.xlu1 %112 }
 0x19c   :  { %618 = vst [vmem:[#allocation2 + $0x300] sm:$0xff] %v609_v37  ;;  %620 = vst [vmem:[#allocation2 + $0x310] sm:$0xff] %v611_v39  ;;  %v485_v54 = vmul.f32 %v483_v46, %v1583_v42  ;;  %v487_v55 = vmul.f32 %v483_v46, %v1589_v8  ;;  %v489_v56 = vmul.f32 %v483_v46, %v1596_v45 }
 0x19d   :  { %622 = vst [vmem:[#allocation2 + $0x320] sm:$0xff] %v613_v43  ;;  %624 = vst [vmem:[#allocation2 + $0x330] sm:$0xff] %v615_v40  ;;  %v491_v57 = vmul.f32 %v483_v46, %v1605_v12  ;;  %v510_v9 = vmul.f32 %v508_v24, %v1583_v42  ;;  %v512_v59 = vmul.f32 %v508_v24, %v1589_v8 }
 0x19e   :  { %643 = vst [vmem:[#allocation2 + $0x380] sm:$0xff] %v634_v17  ;;  %645 = vst [vmem:[#allocation2 + $0x390] sm:$0xff] %v636_v58  ;;  %v514_v60 = vmul.f32 %v508_v24, %v1596_v45  ;;  %v516_v7 = vmul.f32 %v508_v24, %v1605_v12  ;;  %v535_v62 = vmul.f32 %v533_v34, %v1583_v42 }
 0x19f   :  { %647 = vst [vmem:[#allocation2 + $0x3a0] sm:$0xff] %v638_v19  ;;  %649 = vst [vmem:[#allocation2 + $0x3b0] sm:$0xff] %v640_v38  ;;  %v537_v63 = vmul.f32 %v533_v34, %v1589_v8  ;;  %v539_v0 = vmul.f32 %v533_v34, %v1596_v45  ;;  %v541_v4 = vmul.f32 %v533_v34, %v1605_v12 }
 0x1a0   :  { %469 = vst [vmem:[#allocation2 + $0x8] sm:$0xff] %v461_v50  ;;  %471 = vst [vmem:[#allocation2 + $0x18] sm:$0xff] %v463_v51  ;;  %v560_v2 = vmul.f32 %v558_v44, %v1583_v42  ;;  %v562_v5 = vmul.f32 %v558_v44, %v1589_v8  ;;  %v564_v20 = vmul.f32 %v558_v44, %v1596_v45 }
 0x1a1   :  { %473 = vst [vmem:[#allocation2 + $0x28] sm:$0xff] %v465_v52  ;;  %475 = vst [vmem:[#allocation2 + $0x38] sm:$0xff] %v467_v53  ;;  %v566_v15 = vmul.f32 %v558_v44, %v1605_v12  ;;  %v585_v26 = vmul.f32 %v583_v10, %v1583_v42  ;;  %v587_v37 = vmul.f32 %v583_v10, %v1589_v8 }
 0x1a2   :  { %494 = vst [vmem:[#allocation2 + $0x88] sm:$0xff] %v485_v54  ;;  %496 = vst [vmem:[#allocation2 + $0x98] sm:$0xff] %v487_v55  ;;  %v589_v39 = vmul.f32 %v583_v10, %v1596_v45  ;;  %v591_v43 = vmul.f32 %v583_v10, %v1605_v12  ;;  %v610_v40 = vmul.f32 %v608_v21, %v1583_v42 }
 0x1a3   :  { %498 = vst [vmem:[#allocation2 + $0xa8] sm:$0xff] %v489_v56  ;;  %500 = vst [vmem:[#allocation2 + $0xb8] sm:$0xff] %v491_v57  ;;  %v612_v17 = vmul.f32 %v608_v21, %v1589_v8  ;;  %v614_v58 = vmul.f32 %v608_v21, %v1596_v45  ;;  %v616_v19 = vmul.f32 %v608_v21, %v1605_v12 }
 0x1a4   :  { %519 = vst [vmem:[#allocation2 + $0x108] sm:$0xff] %v510_v9  ;;  %521 = vst [vmem:[#allocation2 + $0x118] sm:$0xff] %v512_v59  ;;  %v635_v38 = vmul.f32 %v633_v48, %v1583_v42  ;;  %v637_v61 = vmul.f32 %v633_v48, %v1589_v8  ;;  %v639_v46 = vmul.f32 %v633_v48, %v1596_v45 }
 0x1a5   :  { %523 = vst [vmem:[#allocation2 + $0x128] sm:$0xff] %v514_v60  ;;  %525 = vst [vmem:[#allocation2 + $0x138] sm:$0xff] %v516_v7  ;;  %v641_v24 = vmul.f32 %v633_v48, %v1605_v12  ;;  %v1702_v34 = vadd.f32 %v1485_v11, %v108_v22  ;;  %v1705_v44 = vadd.f32 %v1489_v13, %v108_v22 }
 0x1a6   :  { %544 = vst [vmem:[#allocation2 + $0x188] sm:$0xff] %v535_v62  ;;  %546 = vst [vmem:[#allocation2 + $0x198] sm:$0xff] %v537_v63  ;;  %v1708_v10 = vadd.f32 %v1493_v16, %v113_v23  ;;  %v713_v42 = vmul.f32 %v1639_v31, %v1529_v3  ;;  %v1713_v8 = vadd.f32 %v1497_v18, %v113_v23 }
 0x1a7   :  { %548 = vst [vmem:[#allocation2 + $0x1a8] sm:$0xff] %v539_v0  ;;  %550 = vst [vmem:[#allocation2 + $0x1b8] sm:$0xff] %v541_v4  ;;  %v1717_v11 = vadd.f32 %v1505_v29, %v1659_v6  ;;  %v1721_v13 = vadd.f32 %v1507_v33, %v1659_v6  ;;  %v1725_v16 = vmul.f32 %v1645_v14, %v1532_v1 }
 0x1a8   :  { %569 = vst [vmem:[#allocation2 + $0x208] sm:$0xff] %v560_v2  ;;  %571 = vst [vmem:[#allocation2 + $0x218] sm:$0xff] %v562_v5  ;;  %v718_v3 = vrot.slane %v713_v42, %v1515_v47  ;;  %v742_v18 = vrot.slane %v713_v42, %v1518_v49  ;;  %v766_v45 = vrot.slane %v713_v42, %v1556_v25 }
 0x1a9   :  { %573 = vst [vmem:[#allocation2 + $0x228] sm:$0xff] %v564_v20  ;;  %575 = vst [vmem:[#allocation2 + $0x238] sm:$0xff] %v566_v15  ;;  %v790_v12 = vrot.slane %v713_v42, %v1559_v27  ;;  %v814_v31 = vrot.slane %v713_v42, %v1562_v28  ;;  %v838_v29 = vrot.slane %v713_v42, %v1565_v30 }
 0x1aa   :  { %594 = vst [vmem:[#allocation2 + $0x288] sm:$0xff] %v585_v26  ;;  %596 = vst [vmem:[#allocation2 + $0x298] sm:$0xff] %v587_v37  ;;  %v862_v21 = vrot.slane %v713_v42, %v1574_v35  ;;  %v886_v33 = vrot.slane %v713_v42, %v1577_v36  ;;  %v723_v6 = vmul.f32 %v718_v3, %v1717_v11 }
 0x1ab   :  { %598 = vst [vmem:[#allocation2 + $0x2a8] sm:$0xff] %v589_v39  ;;  %600 = vst [vmem:[#allocation2 + $0x2b8] sm:$0xff] %v591_v43  ;;  %v725_v1 = vmul.f32 %v718_v3, %v1568_v32  ;;  %v727_v14 = vmul.f32 %v718_v3, %v1702_v34  ;;  %v729_v48 = vmul.f32 %v718_v3, %v1708_v10 }
 0x1ac   :  { %619 = vst [vmem:[#allocation2 + $0x308] sm:$0xff] %v610_v40  ;;  %621 = vst [vmem:[#allocation2 + $0x318] sm:$0xff] %v612_v17  ;;  %v747_v50 = vmul.f32 %v742_v18, %v1717_v11  ;;  %v749_v51 = vmul.f32 %v742_v18, %v1568_v32  ;;  %v751_v52 = vmul.f32 %v742_v18, %v1702_v34 }
 0x1ad   :  { %623 = vst [vmem:[#allocation2 + $0x328] sm:$0xff] %v614_v58  ;;  %625 = vst [vmem:[#allocation2 + $0x338] sm:$0xff] %v616_v19  ;;  %v753_v53 = vmul.f32 %v742_v18, %v1708_v10  ;;  %v771_v54 = vmul.f32 %v766_v45, %v1717_v11  ;;  %v773_v55 = vmul.f32 %v766_v45, %v1568_v32 }
 0x1ae   :  { %644 = vst [vmem:[#allocation2 + $0x388] sm:$0xff] %v635_v38  ;;  %646 = vst [vmem:[#allocation2 + $0x398] sm:$0xff] %v637_v61  ;;  %v775_v56 = vmul.f32 %v766_v45, %v1702_v34  ;;  %v777_v57 = vmul.f32 %v766_v45, %v1708_v10  ;;  %v795_v9 = vmul.f32 %v790_v12, %v1717_v11 }
 0x1af   :  { %648 = vst [vmem:[#allocation2 + $0x3a8] sm:$0xff] %v639_v46  ;;  %650 = vst [vmem:[#allocation2 + $0x3b8] sm:$0xff] %v641_v24  ;;  %v797_v59 = vmul.f32 %v790_v12, %v1568_v32  ;;  %v799_v60 = vmul.f32 %v790_v12, %v1702_v34  ;;  %v801_v7 = vmul.f32 %v790_v12, %v1708_v10 }
 0x1b0   :  { %731 = vst [vmem:[#allocation2 + $0x40] sm:$0xff] %v723_v6  ;;  %733 = vst [vmem:[#allocation2 + $0x50] sm:$0xff] %v725_v1  ;;  %v819_v62 = vmul.f32 %v814_v31, %v1717_v11  ;;  %v821_v63 = vmul.f32 %v814_v31, %v1568_v32  ;;  %v823_v0 = vmul.f32 %v814_v31, %v1702_v34 }
 0x1b1   :  { %735 = vst [vmem:[#allocation2 + $0x60] sm:$0xff] %v727_v14  ;;  %737 = vst [vmem:[#allocation2 + $0x70] sm:$0xff] %v729_v48  ;;  %v825_v4 = vmul.f32 %v814_v31, %v1708_v10  ;;  %v843_v2 = vmul.f32 %v838_v29, %v1717_v11  ;;  %v845_v5 = vmul.f32 %v838_v29, %v1568_v32 }
 0x1b2   :  { %755 = vst [vmem:[#allocation2 + $0xc0] sm:$0xff] %v747_v50  ;;  %757 = vst [vmem:[#allocation2 + $0xd0] sm:$0xff] %v749_v51  ;;  %v847_v20 = vmul.f32 %v838_v29, %v1702_v34  ;;  %v849_v15 = vmul.f32 %v838_v29, %v1708_v10  ;;  %v867_v22 = vmul.f32 %v862_v21, %v1717_v11 }
 0x1b3   :  { %759 = vst [vmem:[#allocation2 + $0xe0] sm:$0xff] %v751_v52  ;;  %761 = vst [vmem:[#allocation2 + $0xf0] sm:$0xff] %v753_v53  ;;  %v869_v23 = vmul.f32 %v862_v21, %v1568_v32  ;;  %v871_v26 = vmul.f32 %v862_v21, %v1702_v34  ;;  %v873_v37 = vmul.f32 %v862_v21, %v1708_v10 }
 0x1b4   :  { %779 = vst [vmem:[#allocation2 + $0x140] sm:$0xff] %v771_v54  ;;  %781 = vst [vmem:[#allocation2 + $0x150] sm:$0xff] %v773_v55  ;;  %v891_v39 = vmul.f32 %v886_v33, %v1717_v11  ;;  %v893_v43 = vmul.f32 %v886_v33, %v1568_v32  ;;  %v895_v40 = vmul.f32 %v886_v33, %v1702_v34 }
 0x1b5   :  { %783 = vst [vmem:[#allocation2 + $0x160] sm:$0xff] %v775_v56  ;;  %785 = vst [vmem:[#allocation2 + $0x170] sm:$0xff] %v777_v57  ;;  %v897_v17 = vmul.f32 %v886_v33, %v1708_v10  ;;  %v722_v58 = vrot.slane %v1725_v16, %v1515_v47  ;;  %v746_v19 = vrot.slane %v1725_v16, %v1518_v49 }
 0x1b6   :  { %803 = vst [vmem:[#allocation2 + $0x1c0] sm:$0xff] %v795_v9  ;;  %805 = vst [vmem:[#allocation2 + $0x1d0] sm:$0xff] %v797_v59  ;;  %v770_v38 = vrot.slane %v1725_v16, %v1556_v25  ;;  %v794_v32 = vrot.slane %v1725_v16, %v1559_v27  ;;  %v818_v61 = vrot.slane %v1725_v16, %v1562_v28 }
 0x1b7   :  { %807 = vst [vmem:[#allocation2 + $0x1e0] sm:$0xff] %v799_v60  ;;  %809 = vst [vmem:[#allocation2 + $0x1f0] sm:$0xff] %v801_v7  ;;  %v842_v46 = vrot.slane %v1725_v16, %v1565_v30  ;;  %v866_v47 = vrot.slane %v1725_v16, %v1574_v35  ;;  %v890_v49 = vrot.slane %v1725_v16, %v1577_v36 }
 0x1b8   :  { %827 = vst [vmem:[#allocation2 + $0x240] sm:$0xff] %v819_v62  ;;  %829 = vst [vmem:[#allocation2 + $0x250] sm:$0xff] %v821_v63  ;;  %v724_v25 = vmul.f32 %v722_v58, %v1721_v13  ;;  %v726_v27 = vmul.f32 %v722_v58, %v1580_v41  ;;  %v728_v24 = vmul.f32 %v722_v58, %v1705_v44 }
 0x1b9   :  { %831 = vst [vmem:[#allocation2 + $0x260] sm:$0xff] %v823_v0  ;;  %833 = vst [vmem:[#allocation2 + $0x270] sm:$0xff] %v825_v4  ;;  %v730_v34 = vmul.f32 %v722_v58, %v1713_v8  ;;  %v748_v10 = vmul.f32 %v746_v19, %v1721_v13  ;;  %v750_v28 = vmul.f32 %v746_v19, %v1580_v41 }
 0x1ba   :  { %851 = vst [vmem:[#allocation2 + $0x2c0] sm:$0xff] %v843_v2  ;;  %853 = vst [vmem:[#allocation2 + $0x2d0] sm:$0xff] %v845_v5  ;;  %v752_v30 = vmul.f32 %v746_v19, %v1705_v44  ;;  %v754_v42 = vmul.f32 %v746_v19, %v1713_v8  ;;  %v772_v35 = vmul.f32 %v770_v38, %v1721_v13 }
 0x1bb   :  { %855 = vst [vmem:[#allocation2 + $0x2e0] sm:$0xff] %v847_v20  ;;  %857 = vst [vmem:[#allocation2 + $0x2f0] sm:$0xff] %v849_v15  ;;  %v774_v36 = vmul.f32 %v770_v38, %v1580_v41  ;;  %v776_v11 = vmul.f32 %v770_v38, %v1705_v44  ;;  %v778_v16 = vmul.f32 %v770_v38, %v1713_v8 }
 0x1bc   :  { %875 = vst [vmem:[#allocation2 + $0x340] sm:$0xff] %v867_v22  ;;  %877 = vst [vmem:[#allocation2 + $0x350] sm:$0xff] %v869_v23  ;;  %v796_v3 = vmul.f32 %v794_v32, %v1721_v13  ;;  %v798_v18 = vmul.f32 %v794_v32, %v1580_v41  ;;  %v800_v45 = vmul.f32 %v794_v32, %v1705_v44 }
 0x1bd   :  { %879 = vst [vmem:[#allocation2 + $0x360] sm:$0xff] %v871_v26  ;;  %881 = vst [vmem:[#allocation2 + $0x370] sm:$0xff] %v873_v37  ;;  %v802_v12 = vmul.f32 %v794_v32, %v1713_v8  ;;  %v820_v31 = vmul.f32 %v818_v61, %v1721_v13  ;;  %v822_v29 = vmul.f32 %v818_v61, %v1580_v41 }
 0x1be   :  { %899 = vst [vmem:[#allocation2 + $0x3c0] sm:$0xff] %v891_v39  ;;  %901 = vst [vmem:[#allocation2 + $0x3d0] sm:$0xff] %v893_v43  ;;  %v824_v21 = vmul.f32 %v818_v61, %v1705_v44  ;;  %v826_v33 = vmul.f32 %v818_v61, %v1713_v8  ;;  %v844_v6 = vmul.f32 %v842_v46, %v1721_v13 }
 0x1bf   :  { %903 = vst [vmem:[#allocation2 + $0x3e0] sm:$0xff] %v895_v40  ;;  %905 = vst [vmem:[#allocation2 + $0x3f0] sm:$0xff] %v897_v17  ;;  %v846_v1 = vmul.f32 %v842_v46, %v1580_v41  ;;  %v848_v14 = vmul.f32 %v842_v46, %v1705_v44  ;;  %v850_v48 = vmul.f32 %v842_v46, %v1713_v8 }
 0x1c0   :  { %732 = vst [vmem:[#allocation2 + $0x48] sm:$0xff] %v724_v25  ;;  %734 = vst [vmem:[#allocation2 + $0x58] sm:$0xff] %v726_v27  ;;  %v868_v50 = vmul.f32 %v866_v47, %v1721_v13  ;;  %v870_v51 = vmul.f32 %v866_v47, %v1580_v41  ;;  %v872_v52 = vmul.f32 %v866_v47, %v1705_v44 }
 0x1c1   :  { %736 = vst [vmem:[#allocation2 + $0x68] sm:$0xff] %v728_v24  ;;  %738 = vst [vmem:[#allocation2 + $0x78] sm:$0xff] %v730_v34  ;;  %v874_v53 = vmul.f32 %v866_v47, %v1713_v8  ;;  %v892_v54 = vmul.f32 %v890_v49, %v1721_v13  ;;  %v894_v55 = vmul.f32 %v890_v49, %v1580_v41 }
 0x1c2   :  { %756 = vst [vmem:[#allocation2 + $0xc8] sm:$0xff] %v748_v10  ;;  %758 = vst [vmem:[#allocation2 + $0xd8] sm:$0xff] %v750_v28  ;;  %v896_v56 = vmul.f32 %v890_v49, %v1705_v44  ;;  %v898_v57 = vmul.f32 %v890_v49, %v1713_v8 }
 0x1c3   :  { %760 = vst [vmem:[#allocation2 + $0xe8] sm:$0xff] %v752_v30  ;;  %762 = vst [vmem:[#allocation2 + $0xf8] sm:$0xff] %v754_v42 }
 0x1c4   :  { %780 = vst [vmem:[#allocation2 + $0x148] sm:$0xff] %v772_v35  ;;  %782 = vst [vmem:[#allocation2 + $0x158] sm:$0xff] %v774_v36 }
 0x1c5   :  { %784 = vst [vmem:[#allocation2 + $0x168] sm:$0xff] %v776_v11  ;;  %786 = vst [vmem:[#allocation2 + $0x178] sm:$0xff] %v778_v16 }
 0x1c6   :  { %804 = vst [vmem:[#allocation2 + $0x1c8] sm:$0xff] %v796_v3  ;;  %806 = vst [vmem:[#allocation2 + $0x1d8] sm:$0xff] %v798_v18 }
 0x1c7   :  { %808 = vst [vmem:[#allocation2 + $0x1e8] sm:$0xff] %v800_v45  ;;  %810 = vst [vmem:[#allocation2 + $0x1f8] sm:$0xff] %v802_v12 }
 0x1c8   :  { %828 = vst [vmem:[#allocation2 + $0x248] sm:$0xff] %v820_v31  ;;  %830 = vst [vmem:[#allocation2 + $0x258] sm:$0xff] %v822_v29 }
 0x1c9   :  { %832 = vst [vmem:[#allocation2 + $0x268] sm:$0xff] %v824_v21  ;;  %834 = vst [vmem:[#allocation2 + $0x278] sm:$0xff] %v826_v33 }
 0x1ca   :  { %852 = vst [vmem:[#allocation2 + $0x2c8] sm:$0xff] %v844_v6  ;;  %854 = vst [vmem:[#allocation2 + $0x2d8] sm:$0xff] %v846_v1 }
 0x1cb   :  { %856 = vst [vmem:[#allocation2 + $0x2e8] sm:$0xff] %v848_v14  ;;  %858 = vst [vmem:[#allocation2 + $0x2f8] sm:$0xff] %v850_v48 }
 0x1cc   :  { %876 = vst [vmem:[#allocation2 + $0x348] sm:$0xff] %v868_v50  ;;  %878 = vst [vmem:[#allocation2 + $0x358] sm:$0xff] %v870_v51 }
 0x1cd   :  { %880 = vst [vmem:[#allocation2 + $0x368] sm:$0xff] %v872_v52  ;;  %882 = vst [vmem:[#allocation2 + $0x378] sm:$0xff] %v874_v53 }
 0x1ce   :  { %900 = vst [vmem:[#allocation2 + $0x3c8] sm:$0xff] %v892_v54  ;;  %902 = vst [vmem:[#allocation2 + $0x3d8] sm:$0xff] %v894_v55 }
 0x1cf   :  { %904 = vst [vmem:[#allocation2 + $0x3e8] sm:$0xff] %v896_v56  ;;  %906 = vst [vmem:[#allocation2 + $0x3f8] sm:$0xff] %v898_v57 }
 0x1d0   :  { %1171 = shalt.err (!%p1168_p12)
}
 0x1d1   :  { %s1172_s9 = scalar_lea.hbm %s1838_s4, 16384 }
 0x1d2   :  { %p1173_p13 = scmp.ne.s32.totalorder %s1838_s4, %s1172_s9  ;;  %p1176_p0 = scmp.lt.u32.totalorder %s1172_s9, %s1838_s4 }
 0x1d4   :  { %p1178_p1 = pnand %p1176_p0, %p1173_p13 }
 0x1d6   :  { %1181 = shalt.err (!%p1178_p1)
}
 0x1d7   :  { %s1189_s13 = smov 256   ;;  %s1190_s14 = smov 16  }
 0x1d8   :  { %922 = dma.vmem_to_hbm [thread:$0]  %s1811_s6, 16384, %s1838_s4, [#allocation3], %s1189_s13, %s1189_s13, %s1190_s14  }
 0x1d9   :  { %1182 = dma.done.wait [#allocation3], 16384  }
 0x1da   :  { %1183 = vsyncadd [#allocation3], 4294950912 }
 0x1db   :  { %1184 = dma.done.wait [#allocation5], 256  }
 0x1dc   :  { %1185 = vsyncadd [#allocation5], 4294967040 }
 0x1dd   :  { %939 = vsyncpa [#allocation3], 1 }
 0x1de   :  { %940 = vsyncpa [#allocation5], 1 }

</bundles_post_ra>
